<compile_context>
chip_gen: v7x
topology: tpu7x:2x2x1
jax: 0.10.0
libtpu: 0.0.40
codegen_flags: <defaults>
</compile_context>

<pallas_src>
import functools

import jax
import jax.numpy as jnp
from jax.experimental import pallas as pl
from jax.experimental.pallas import tpu as pltpu


def _round_up(x, m):
    return ((x + m - 1) // m) * m


# ---------------------------------------------------------------------------
# Recurrent LSTM kernel: grid walks T-chunks, h/c carried in VMEM scratch.
# ---------------------------------------------------------------------------
def _lstm_recurrent_kernel(xproj_ref, whh_ref, hseq_ref, h_ref, c_ref, *,
                           hidden, unroll):
    """One T-chunk of the LSTM recurrence.

    xproj_ref: (tt, B, 4H) f32  pre-projected inputs x @ W_ih^T + (b_ih+b_hh),
                                gate order [i|f|g|o] contiguous on the lane axis
    whh_ref:   (H, 4H)     bf16 fused hidden-to-hidden weight (W_hh^T)
    hseq_ref:  (tt, B, H)  bf16 output hidden states for this chunk
    h_ref:     (B, H)      f32  VMEM scratch, hidden state (persists across grid)
    c_ref:     (B, H)      f32  VMEM scratch, cell state   (persists across grid)
    """
    # PyTorch forward calls the LSTM with states=None -> zero init at chunk 0.
    @pl.when(pl.program_id(0) == 0)
    def _():
        h_ref[...] = jnp.zeros_like(h_ref)
        c_ref[...] = jnp.zeros_like(c_ref)

    tt = xproj_ref.shape[0]
    H = hidden

    def step(t, carry):
        xp = xproj_ref[t]                               # (B, 4H) f32, bias folded
        hb = h_ref[...].astype(whh_ref.dtype)           # bf16 MXU operand
        # Single fused MXU push per step: (B, H) @ (H, 4H) -> (B, 4H) f32.
        gates = xp + jnp.dot(hb, whh_ref[...],
                             preferred_element_type=jnp.float32)
        i_g = jax.nn.sigmoid(gates[:, 0 * H:1 * H])
        f_g = jax.nn.sigmoid(gates[:, 1 * H:2 * H])
        g_g = jnp.tanh(gates[:, 2 * H:3 * H])
        o_g = jax.nn.sigmoid(gates[:, 3 * H:4 * H])

        c_new = f_g * c_ref[...] + i_g * g_g
        h_new = o_g * jnp.tanh(c_new)

        c_ref[...] = c_new
        h_ref[...] = h_new
        hseq_ref[t] = h_new.astype(hseq_ref.dtype)
        return carry

    jax.lax.fori_loop(0, tt, step, 0, unroll=unroll)


# ---------------------------------------------------------------------------
# Vocab projection kernel: logits = h @ W_lin^T + b, 2-D parallel grid (M, V).
# ---------------------------------------------------------------------------
def _vocab_proj_kernel(h_ref, w_ref, b_ref, out_ref):
    """h_ref: (tm, H) bf16, w_ref: (H, tn) bf16, b_ref: (1, tn) f32 -> (tm, tn)."""
    out_ref[...] = (jnp.dot(h_ref[...], w_ref[...],
                            preferred_element_type=jnp.float32)
                    + b_ref[...]).astype(out_ref.dtype)


# ---------------------------------------------------------------------------
# Wrapper: embedding glue + the two pallas_calls.
# ---------------------------------------------------------------------------
def decoder_rnn_forward(features, captions, params, *, time_chunk=32):
    """features: (B, E) f32, captions: (B, L) int32.  Returns (B, L, V) f32."""
    embed_tbl = params["embed"]     # (V, E)  f32
    w_ih_t = params["w_ih_t"]       # (E, 4H) bf16
    w_hh_t = params["w_hh_t"]       # (H, 4H) bf16
    b = params["b"]                 # (1, 4H) f32   (= b_ih + b_hh)
    w_lin_t = params["w_lin_t"]     # (H, V)  bf16
    b_lin = params["b_lin"]         # (1, V)  f32

    B, E = features.shape
    L = captions.shape[1]
    T = L                            # features + (L-1) embedded tokens
    H = w_hh_t.shape[0]
    V = w_lin_t.shape[1]

    # --- Glue (plain XLA): gather embeddings directly in time-major order. ---
    emb_tm = jnp.take(embed_tbl, captions[:, :-1].T, axis=0)          # (T-1, B, E)
    seq_tm = jnp.concatenate([features[None, :, :], emb_tm], axis=0)  # (T, B, E)

    # Pad T so the time-chunked grid divides evenly; padded steps come after
    # every real step so they never affect the real outputs.
    tt = min(T, time_chunk)
    T_pad = _round_up(T, tt)
    if T_pad != T:
        seq_tm = jnp.pad(seq_tm, ((0, T_pad - T), (0, 0), (0, 0)))

    # --- Hoisted, time-parallel input projection with fused gate layout. ---
    # xproj[t] = seq[t] @ W_ih^T + (b_ih + b_hh)    -> (T_pad, B, 4H) f32
    xproj = jnp.einsum("tbe,eh->tbh",
                       seq_tm.astype(jnp.bfloat16), w_ih_t,
                       preferred_element_type=jnp.float32) + b
    # TODO(synk): optionally store xproj in bf16 (halves its HBM/VMEM traffic)
    # once error growth at realistic sequence lengths has been validated.

    # --- Recurrent kernel: grid streams T-chunks, h/c live in VMEM scratch. ---
    rec_vmem = (2 * tt * B * 4 * H * 4     # xproj blocks (double-buffered, f32)
                + 2 * H * 4 * H * 2        # w_hh blocks (bf16)
                + 2 * tt * B * H * 2       # hseq blocks (bf16)
                + 2 * B * H * 4)           # h/c scratch (f32)
    rec_limit = min(64 * 1024 * 1024, max(4 * 1024 * 1024, 4 * rec_vmem))
    h_seq = pl.pallas_call(
        functools.partial(_lstm_recurrent_kernel, hidden=H,
                          unroll=min(tt, 8)),
        out_shape=jax.ShapeDtypeStruct((T_pad, B, H), jnp.bfloat16),
        grid_spec=pltpu.PrefetchScalarGridSpec(
            num_scalar_prefetch=0,
            grid=(T_pad // tt,),
            in_specs=[
                pl.BlockSpec((tt, B, 4 * H), lambda t: (t, 0, 0)),
                pl.BlockSpec((H, 4 * H), lambda t: (0, 0)),
            ],
            out_specs=pl.BlockSpec((tt, B, H), lambda t: (t, 0, 0)),
            scratch_shapes=[
                pltpu.VMEM((B, H), jnp.float32),   # h state
                pltpu.VMEM((B, H), jnp.float32),   # c state
            ],
        ),
        compiler_params=pltpu.CompilerParams(
            dimension_semantics=("arbitrary",),    # recurrence is serial
            vmem_limit_bytes=rec_limit),
    )(xproj, w_hh_t)

    # --- Vocab projection over all (B*T) rows, tiled over rows and V. ---
    # Transpose the *small* hidden tensor (never the big logits tensor).
    # TODO(synk): fold this transpose/reshape into the vocab kernel index_map.
    h_bt = jnp.transpose(h_seq[:T], (1, 0, 2)).reshape(B * T, H)      # (B*T, H) bf16

    M = B * T
    tm = min(256, _round_up(M, 8))
    tn = 512 if V >= 512 else _round_up(V, 128)
    voc_vmem = (2 * tm * H * 2 + 2 * H * tn * 2 + 2 * tn * 4 + 2 * tm * tn * 4)
    voc_limit = min(64 * 1024 * 1024, max(4 * 1024 * 1024, 4 * voc_vmem))
    logits = pl.pallas_call(
        _vocab_proj_kernel,
        out_shape=jax.ShapeDtypeStruct((M, V), jnp.float32),
        grid_spec=pltpu.PrefetchScalarGridSpec(
            num_scalar_prefetch=0,
            grid=(pl.cdiv(M, tm), pl.cdiv(V, tn)),
            in_specs=[
                pl.BlockSpec((tm, H), lambda i, j: (i, 0)),
                pl.BlockSpec((H, tn), lambda i, j: (0, j)),
                pl.BlockSpec((1, tn), lambda i, j: (0, j)),
            ],
            out_specs=pl.BlockSpec((tm, tn), lambda i, j: (i, j)),
        ),
        compiler_params=pltpu.CompilerParams(
            dimension_semantics=("parallel", "parallel"),
            vmem_limit_bytes=voc_limit),
    )(h_bt, w_lin_t, b_lin)
    # TODO(synk): emit bf16 logits if the downstream consumer tolerates it
    # (halves the dominant HBM writeback of the (B, T, V) tensor).

    return logits.reshape(B, T, V)


# ---------------------------------------------------------------------------
# Pure-JAX f32 reference replicating the PyTorch forward semantics.
# ---------------------------------------------------------------------------
def decoder_rnn_reference(features, captions, raw):
    embeds = jnp.take(raw["embed"], captions[:, :-1], axis=0)       # (B, L-1, E)
    seq = jnp.concatenate([features[:, None, :], embeds], axis=1)   # (B, T, E)
    B, T, _ = seq.shape
    H = raw["w_hh"].shape[1]
    w_ih_t = raw["w_ih"].T                    # (E, 4H)
    w_hh_t = raw["w_hh"].T                    # (H, 4H)
    b = (raw["b_ih"] + raw["b_hh"])[None, :]  # (1, 4H)

    def step(carry, x_t):
        h, c = carry
        gates = x_t @ w_ih_t + h @ w_hh_t + b
        i = jax.nn.sigmoid(gates[:, 0 * H:1 * H])
        f = jax.nn.sigmoid(gates[:, 1 * H:2 * H])
        g = jnp.tanh(gates[:, 2 * H:3 * H])
        o = jax.nn.sigmoid(gates[:, 3 * H:4 * H])
        c = f * c + i * g
        h = o * jnp.tanh(c)
        return (h, c), h

    init = (jnp.zeros((B, H), jnp.float32), jnp.zeros((B, H), jnp.float32))
    _, hs = jax.lax.scan(step, init, jnp.transpose(seq, (1, 0, 2)))  # (T, B, H)
    logits = hs @ raw["w_lin"].T + raw["b_lin"][None, None, :]       # (T, B, V)
    return jnp.transpose(logits, (1, 0, 2))                          # (B, T, V)


# ---------------------------------------------------------------------------
# Parameter construction (PyTorch-style raw params + kernel-layout prep).
# ---------------------------------------------------------------------------
def make_raw_params(key, embed_size, hidden_size, vocab_size):
    ks = jax.random.split(key, 6)
    s = 0.1
    return {
        "embed": s * jax.random.normal(ks[0], (vocab_size, embed_size), jnp.float32),
        "w_ih": s * jax.random.normal(ks[1], (4 * hidden_size, embed_size), jnp.float32),
        "w_hh": s * jax.random.normal(ks[2], (4 * hidden_size, hidden_size), jnp.float32),
        "b_ih": s * jax.random.normal(ks[3], (4 * hidden_size,), jnp.float32),
        "b_hh": s * jax.random.normal(ks[4], (4 * hidden_size,), jnp.float32),
        "w_lin": s * jax.random.normal(ks[5], (vocab_size, hidden_size), jnp.float32),
        "b_lin": jnp.zeros((vocab_size,), jnp.float32),
    }


def prepare_params(raw):
    """Convert PyTorch-layout params to the fused kernel layout (bf16 MXU operands)."""
    return {
        "embed": raw["embed"],
        # PyTorch gate order along the 4H axis is i, f, g, o; keep it fused.
        "w_ih_t": raw["w_ih"].T.astype(jnp.bfloat16),                    # (E, 4H)
        "w_hh_t": raw["w_hh"].T.astype(jnp.bfloat16),                    # (H, 4H)
        "b": (raw["b_ih"] + raw["b_hh"])[None, :].astype(jnp.float32),   # (1, 4H)
        "w_lin_t": raw["w_lin"].T.astype(jnp.bfloat16),                  # (H, V)
        "b_lin": raw["b_lin"][None, :].astype(jnp.float32),              # (1, V)
    }


if __name__ == "__main__":
    # Small shapes consistent with the module.
    B, L = 2, 8            # batch, caption length (LSTM sequence length = L)
    EMBED = 32
    HIDDEN = 32
    VOCAB = 128

    key = jax.random.PRNGKey(0)
    k_feat, k_cap, k_par = jax.random.split(key, 3)

    features = jax.random.normal(k_feat, (B, EMBED), jnp.float32)
    captions = jax.random.randint(k_cap, (B, L), 0, VOCAB, jnp.int32)
    raw = make_raw_params(k_par, EMBED, HIDDEN, VOCAB)
    params = prepare_params(raw)

    fwd = jax.jit(decoder_rnn_forward)
    out = fwd(features, captions, params)
    out = jax.block_until_ready(out)

    ref = decoder_rnn_reference(features, captions, raw)
    assert out.shape == (B, L, VOCAB), out.shape
    # bf16 MXU operands (f32 accumulation / f32 state) -> relaxed tolerance
    # versus the pure-f32 reference.
    max_err = float(jnp.max(jnp.abs(out - ref)))
    assert max_err < 5e-2, max_err

    print("KERNEL_OK")
</pallas_src>

<mosaic_0001>
module attributes {stable_mosaic.version = 11 : i64} {
  func.func @_vocab_proj_kernel(%arg0: i32, %arg1: i32, %arg2: memref<16x32xbf16, #tpu.memory_space<vmem>>, %arg3: memref<32x128xbf16, #tpu.memory_space<vmem>>, %arg4: memref<1x128xf32, #tpu.memory_space<vmem>>, %arg5: memref<16x128xf32, #tpu.memory_space<vmem>>) attributes {dimension_semantics = [#tpu.dimension_semantics<parallel>, #tpu.dimension_semantics<parallel>], iteration_bounds = array<i64: 1, 1>, scalar_prefetch = 0 : i64, scratch_operands = 0 : i64, tpu.core_type = #tpu.core_type<tc>, window_params = [{transform_indices = @transform_0, window_bounds = array<i64: 16, 32>}, {transform_indices = @transform_1, window_bounds = array<i64: 32, 128>}, {transform_indices = @transform_2, window_bounds = array<i64: 1, 128>}, {transform_indices = @transform_3, window_bounds = array<i64: 16, 128>}]} {
    %c0 = arith.constant 0 : index
    %c0_0 = arith.constant 0 : index
    %0 = vector.load %arg2[%c0, %c0_0] : memref<16x32xbf16, #tpu.memory_space<vmem>>, vector<16x32xbf16>
    %c0_1 = arith.constant 0 : index
    %c0_2 = arith.constant 0 : index
    %1 = vector.load %arg3[%c0_1, %c0_2] : memref<32x128xbf16, #tpu.memory_space<vmem>>, vector<32x128xbf16>
    %cst = arith.constant dense<0.000000e+00> : vector<16x128xf32>
    %2 = tpu.matmul %0, %1, %cst {dimension_numbers = #tpu.dot_dimension_numbers<[1], [0], [0], [1], [0, 0, 1, 1], [], []>} : vector<16x32xbf16>, vector<32x128xbf16>, vector<16x128xf32> -> vector<16x128xf32>
    %c0_3 = arith.constant 0 : index
    %c0_4 = arith.constant 0 : index
    %3 = vector.load %arg4[%c0_3, %c0_4] : memref<1x128xf32, #tpu.memory_space<vmem>>, vector<1x128xf32>
    %4 = vector.broadcast %3 : vector<1x128xf32> to vector<16x128xf32>
    %5 = arith.addf %2, %4 : vector<16x128xf32>
    %c0_5 = arith.constant 0 : index
    %c0_6 = arith.constant 0 : index
    %6 = vector.load %arg5[%c0_5, %c0_6] : memref<16x128xf32, #tpu.memory_space<vmem>>, vector<16x128xf32>
    tpu.vector_store %arg5[%c0_5, %c0_6], %5 {strides = array<i32>} : memref<16x128xf32, #tpu.memory_space<vmem>>, vector<16x128xf32>,
    return
  }
  func.func @transform_0(%arg0: i32, %arg1: i32) -> (i32, i32) {
    %c0_i32 = arith.constant 0 : i32
    %c0_i32_0 = arith.constant 0 : i32
    return %arg0, %c0_i32 : i32, i32
  }
  func.func @transform_1(%arg0: i32, %arg1: i32) -> (i32, i32) {
    %c0_i32 = arith.constant 0 : i32
    %c0_i32_0 = arith.constant 0 : i32
    return %c0_i32, %arg1 : i32, i32
  }
  func.func @transform_2(%arg0: i32, %arg1: i32) -> (i32, i32) {
    %c0_i32 = arith.constant 0 : i32
    %c0_i32_0 = arith.constant 0 : i32
    return %c0_i32, %arg1 : i32, i32
  }
  func.func @transform_3(%arg0: i32, %arg1: i32) -> (i32, i32) {
    %c0_i32 = arith.constant 0 : i32
    return %arg0, %arg1 : i32, i32
  }
}

module attributes {stable_mosaic.version = 11 : i64} {
  func.func @_lstm_recurrent_kernel(%arg0: i32, %arg1: memref<8x2x128xf32, #tpu.memory_space<vmem>>, %arg2: memref<32x128xbf16, #tpu.memory_space<vmem>>, %arg3: memref<8x2x32xbf16, #tpu.memory_space<vmem>>, %arg4: memref<2x32xf32, #tpu.memory_space<vmem>>, %arg5: memref<2x32xf32, #tpu.memory_space<vmem>>) attributes {dimension_semantics = [#tpu.dimension_semantics<arbitrary>], iteration_bounds = array<i64: 1>, scalar_prefetch = 0 : i64, scratch_operands = 2 : i64, tpu.core_type = #tpu.core_type<tc>, window_params = [{transform_indices = @transform_0, window_bounds = array<i64: 8, 2, 128>}, {pipeline_mode = #tpu.pipeline_mode<synchronous>, transform_indices = @transform_1, window_bounds = array<i64: 32, 128>}, {transform_indices = @transform_2, window_bounds = array<i64: 8, 2, 32>}]} {
    %c0_i32 = arith.constant 0 : i32
    %0 = arith.cmpi eq, %arg0, %c0_i32 : i32
    %1 = arith.extui %0 : i1 to i32
    %c0_i32_0 = arith.constant 0 : i32
    %2 = arith.cmpi ne, %1, %c0_i32_0 : i32
    scf.if %2 {
      %cst_144 = arith.constant 0.000000e+00 : f32
      %331 = vector.broadcast %cst_144 : f32 to vector<2x32xf32>
      %c0_145 = arith.constant 0 : index
      %c0_146 = arith.constant 0 : index
      %332 = vector.load %arg4[%c0_145, %c0_146] : memref<2x32xf32, #tpu.memory_space<vmem>>, vector<2x32xf32>
      tpu.vector_store %arg4[%c0_145, %c0_146], %331 {strides = array<i32>} : memref<2x32xf32, #tpu.memory_space<vmem>>, vector<2x32xf32>,
      %cst_147 = arith.constant 0.000000e+00 : f32
      %333 = vector.broadcast %cst_147 : f32 to vector<2x32xf32>
      %c0_148 = arith.constant 0 : index
      %c0_149 = arith.constant 0 : index
      %334 = vector.load %arg5[%c0_148, %c0_149] : memref<2x32xf32, #tpu.memory_space<vmem>>, vector<2x32xf32>
      tpu.vector_store %arg5[%c0_148, %c0_149], %333 {strides = array<i32>} : memref<2x32xf32, #tpu.memory_space<vmem>>, vector<2x32xf32>,
    } else {
    }
    %c0_i32_1 = arith.constant 0 : i32
    %3 = arith.index_cast %c0_i32_1 : i32 to index
    %c0 = arith.constant 0 : index
    %c0_2 = arith.constant 0 : index
    %4 = vector.load %arg1[%3, %c0, %c0_2] : memref<8x2x128xf32, #tpu.memory_space<vmem>>, vector<1x2x128xf32>
    %5 = vector.shape_cast %4 : vector<1x2x128xf32> to vector<2x128xf32>
    %c0_3 = arith.constant 0 : index
    %c0_4 = arith.constant 0 : index
    %6 = vector.load %arg4[%c0_3, %c0_4] : memref<2x32xf32, #tpu.memory_space<vmem>>, vector<2x32xf32>
    %7 = arith.truncf %6 : vector<2x32xf32> to vector<2x32xbf16>
    %c0_5 = arith.constant 0 : index
    %c0_6 = arith.constant 0 : index
    %8 = vector.load %arg2[%c0_5, %c0_6] : memref<32x128xbf16, #tpu.memory_space<vmem>>, vector<32x128xbf16>
    %cst = arith.constant dense<0.000000e+00> : vector<2x128xf32>
    %9 = tpu.matmul %7, %8, %cst {dimension_numbers = #tpu.dot_dimension_numbers<[1], [0], [0], [1], [0, 0, 1, 1], [], []>} : vector<2x32xbf16>, vector<32x128xbf16>, vector<2x128xf32> -> vector<2x128xf32>
    %10 = arith.addf %5, %9 : vector<2x128xf32>
    %11 = vector.extract_strided_slice %10 {offsets = [0, 0], sizes = [2, 32], strides = [1, 1]} : vector<2x128xf32> to vector<2x32xf32>
    %12 = arith.negf %11 : vector<2x32xf32>
    %13 = math.exp %12 : vector<2x32xf32>
    %cst_7 = arith.constant 1.000000e+00 : f32
    %14 = vector.broadcast %cst_7 : f32 to vector<2x32xf32>
    %15 = arith.addf %14, %13 : vector<2x32xf32>
    %16 = arith.divf %14, %15 : vector<2x32xf32>
    %17 = vector.extract_strided_slice %10 {offsets = [0, 32], sizes = [2, 32], strides = [1, 1]} : vector<2x128xf32> to vector<2x32xf32>
    %18 = arith.negf %17 : vector<2x32xf32>
    %19 = math.exp %18 : vector<2x32xf32>
    %cst_8 = arith.constant 1.000000e+00 : f32
    %20 = vector.broadcast %cst_8 : f32 to vector<2x32xf32>
    %21 = arith.addf %20, %19 : vector<2x32xf32>
    %22 = arith.divf %20, %21 : vector<2x32xf32>
    %23 = vector.extract_strided_slice %10 {offsets = [0, 64], sizes = [2, 32], strides = [1, 1]} : vector<2x128xf32> to vector<2x32xf32>
    %24 = math.tanh %23 : vector<2x32xf32>
    %25 = vector.extract_strided_slice %10 {offsets = [0, 96], sizes = [2, 32], strides = [1, 1]} : vector<2x128xf32> to vector<2x32xf32>
    %26 = arith.negf %25 : vector<2x32xf32>
    %27 = math.exp %26 : vector<2x32xf32>
    %cst_9 = arith.constant 1.000000e+00 : f32
    %28 = vector.broadcast %cst_9 : f32 to vector<2x32xf32>
    %29 = arith.addf %28, %27 : vector<2x32xf32>
    %30 = arith.divf %28, %29 : vector<2x32xf32>
    %c0_10 = arith.constant 0 : index
    %c0_11 = arith.constant 0 : index
    %31 = vector.load %arg5[%c0_10, %c0_11] : memref<2x32xf32, #tpu.memory_space<vmem>>, vector<2x32xf32>
    %32 = arith.mulf %22, %31 : vector<2x32xf32>
    %33 = arith.mulf %16, %24 : vector<2x32xf32>
    %34 = arith.addf %32, %33 : vector<2x32xf32>
    %35 = math.tanh %34 : vector<2x32xf32>
    %36 = arith.mulf %30, %35 : vector<2x32xf32>
    %c0_12 = arith.constant 0 : index
    %c0_13 = arith.constant 0 : index
    %37 = vector.load %arg5[%c0_12, %c0_13] : memref<2x32xf32, #tpu.memory_space<vmem>>, vector<2x32xf32>
    tpu.vector_store %arg5[%c0_12, %c0_13], %34 {strides = array<i32>} : memref<2x32xf32, #tpu.memory_space<vmem>>, vector<2x32xf32>,
    %c0_14 = arith.constant 0 : index
    %c0_15 = arith.constant 0 : index
    %38 = vector.load %arg4[%c0_14, %c0_15] : memref<2x32xf32, #tpu.memory_space<vmem>>, vector<2x32xf32>
    tpu.vector_store %arg4[%c0_14, %c0_15], %36 {strides = array<i32>} : memref<2x32xf32, #tpu.memory_space<vmem>>, vector<2x32xf32>,
    %39 = arith.truncf %36 : vector<2x32xf32> to vector<2x32xbf16>
    %40 = arith.index_cast %c0_i32_1 : i32 to index
    %c0_16 = arith.constant 0 : index
    %c0_17 = arith.constant 0 : index
    %41 = vector.load %arg3[%40, %c0_16, %c0_17] : memref<8x2x32xbf16, #tpu.memory_space<vmem>>, vector<1x2x32xbf16>
    %42 = vector.shape_cast %41 : vector<1x2x32xbf16> to vector<2x32xbf16>
    %43 = vector.shape_cast %39 : vector<2x32xbf16> to vector<1x2x32xbf16>
    tpu.vector_store %arg3[%40, %c0_16, %c0_17], %43 {strides = array<i32>} : memref<8x2x32xbf16, #tpu.memory_space<vmem>>, vector<1x2x32xbf16>,
    %c1_i32 = arith.constant 1 : i32
    %44 = arith.index_cast %c1_i32 : i32 to index
    %c0_18 = arith.constant 0 : index
    %c0_19 = arith.constant 0 : index
    %45 = vector.load %arg1[%44, %c0_18, %c0_19] : memref<8x2x128xf32, #tpu.memory_space<vmem>>, vector<1x2x128xf32>
    %46 = vector.shape_cast %45 : vector<1x2x128xf32> to vector<2x128xf32>
    %c0_20 = arith.constant 0 : index
    %c0_21 = arith.constant 0 : index
    %47 = vector.load %arg4[%c0_20, %c0_21] : memref<2x32xf32, #tpu.memory_space<vmem>>, vector<2x32xf32>
    %48 = arith.truncf %47 : vector<2x32xf32> to vector<2x32xbf16>
    %c0_22 = arith.constant 0 : index
    %c0_23 = arith.constant 0 : index
    %49 = vector.load %arg2[%c0_22, %c0_23] : memref<32x128xbf16, #tpu.memory_space<vmem>>, vector<32x128xbf16>
    %cst_24 = arith.constant dense<0.000000e+00> : vector<2x128xf32>
    %50 = tpu.matmul %48, %49, %cst_24 {dimension_numbers = #tpu.dot_dimension_numbers<[1], [0], [0], [1], [0, 0, 1, 1], [], []>} : vector<2x32xbf16>, vector<32x128xbf16>, vector<2x128xf32> -> vector<2x128xf32>
    %51 = arith.addf %46, %50 : vector<2x128xf32>
    %52 = vector.extract_strided_slice %51 {offsets = [0, 0], sizes = [2, 32], strides = [1, 1]} : vector<2x128xf32> to vector<2x32xf32>
    %53 = arith.negf %52 : vector<2x32xf32>
    %54 = math.exp %53 : vector<2x32xf32>
    %cst_25 = arith.constant 1.000000e+00 : f32
    %55 = vector.broadcast %cst_25 : f32 to vector<2x32xf32>
    %56 = arith.addf %55, %54 : vector<2x32xf32>
    %57 = arith.divf %55, %56 : vector<2x32xf32>
    %58 = vector.extract_strided_slice %51 {offsets = [0, 32], sizes = [2, 32], strides = [1, 1]} : vector<2x128xf32> to vector<2x32xf32>
    %59 = arith.negf %58 : vector<2x32xf32>
    %60 = math.exp %59 : vector<2x32xf32>
    %cst_26 = arith.constant 1.000000e+00 : f32
    %61 = vector.broadcast %cst_26 : f32 to vector<2x32xf32>
    %62 = arith.addf %61, %60 : vector<2x32xf32>
    %63 = arith.divf %61, %62 : vector<2x32xf32>
    %64 = vector.extract_strided_slice %51 {offsets = [0, 64], sizes = [2, 32], strides = [1, 1]} : vector<2x128xf32> to vector<2x32xf32>
    %65 = math.tanh %64 : vector<2x32xf32>
    %66 = vector.extract_strided_slice %51 {offsets = [0, 96], sizes = [2, 32], strides = [1, 1]} : vector<2x128xf32> to vector<2x32xf32>
    %67 = arith.negf %66 : vector<2x32xf32>
    %68 = math.exp %67 : vector<2x32xf32>
    %cst_27 = arith.constant 1.000000e+00 : f32
    %69 = vector.broadcast %cst_27 : f32 to vector<2x32xf32>
    %70 = arith.addf %69, %68 : vector<2x32xf32>
    %71 = arith.divf %69, %70 : vector<2x32xf32>
    %c0_28 = arith.constant 0 : index
    %c0_29 = arith.constant 0 : index
    %72 = vector.load %arg5[%c0_28, %c0_29] : memref<2x32xf32, #tpu.memory_space<vmem>>, vector<2x32xf32>
    %73 = arith.mulf %63, %72 : vector<2x32xf32>
    %74 = arith.mulf %57, %65 : vector<2x32xf32>
    %75 = arith.addf %73, %74 : vector<2x32xf32>
    %76 = math.tanh %75 : vector<2x32xf32>
    %77 = arith.mulf %71, %76 : vector<2x32xf32>
    %c0_30 = arith.constant 0 : index
    %c0_31 = arith.constant 0 : index
    %78 = vector.load %arg5[%c0_30, %c0_31] : memref<2x32xf32, #tpu.memory_space<vmem>>, vector<2x32xf32>
    tpu.vector_store %arg5[%c0_30, %c0_31], %75 {strides = array<i32>} : memref<2x32xf32, #tpu.memory_space<vmem>>, vector<2x32xf32>,
    %c0_32 = arith.constant 0 : index
    %c0_33 = arith.constant 0 : index
    %79 = vector.load %arg4[%c0_32, %c0_33] : memref<2x32xf32, #tpu.memory_space<vmem>>, vector<2x32xf32>
    tpu.vector_store %arg4[%c0_32, %c0_33], %77 {strides = array<i32>} : memref<2x32xf32, #tpu.memory_space<vmem>>, vector<2x32xf32>,
    %80 = arith.truncf %77 : vector<2x32xf32> to vector<2x32xbf16>
    %81 = arith.index_cast %c1_i32 : i32 to index
    %c0_34 = arith.constant 0 : index
    %c0_35 = arith.constant 0 : index
    %82 = vector.load %arg3[%81, %c0_34, %c0_35] : memref<8x2x32xbf16, #tpu.memory_space<vmem>>, vector<1x2x32xbf16>
    %83 = vector.shape_cast %82 : vector<1x2x32xbf16> to vector<2x32xbf16>
    %84 = vector.shape_cast %80 : vector<2x32xbf16> to vector<1x2x32xbf16>
    tpu.vector_store %arg3[%81, %c0_34, %c0_35], %84 {strides = array<i32>} : memref<8x2x32xbf16, #tpu.memory_space<vmem>>, vector<1x2x32xbf16>,
    %c2_i32 = arith.constant 2 : i32
    %85 = arith.index_cast %c2_i32 : i32 to index
    %c0_36 = arith.constant 0 : index
    %c0_37 = arith.constant 0 : index
    %86 = vector.load %arg1[%85, %c0_36, %c0_37] : memref<8x2x128xf32, #tpu.memory_space<vmem>>, vector<1x2x128xf32>
    %87 = vector.shape_cast %86 : vector<1x2x128xf32> to vector<2x128xf32>
    %c0_38 = arith.constant 0 : index
    %c0_39 = arith.constant 0 : index
    %88 = vector.load %arg4[%c0_38, %c0_39] : memref<2x32xf32, #tpu.memory_space<vmem>>, vector<2x32xf32>
    %89 = arith.truncf %88 : vector<2x32xf32> to vector<2x32xbf16>
    %c0_40 = arith.constant 0 : index
    %c0_41 = arith.constant 0 : index
    %90 = vector.load %arg2[%c0_40, %c0_41] : memref<32x128xbf16, #tpu.memory_space<vmem>>, vector<32x128xbf16>
    %cst_42 = arith.constant dense<0.000000e+00> : vector<2x128xf32>
    %91 = tpu.matmul %89, %90, %cst_42 {dimension_numbers = #tpu.dot_dimension_numbers<[1], [0], [0], [1], [0, 0, 1, 1], [], []>} : vector<2x32xbf16>, vector<32x128xbf16>, vector<2x128xf32> -> vector<2x128xf32>
    %92 = arith.addf %87, %91 : vector<2x128xf32>
    %93 = vector.extract_strided_slice %92 {offsets = [0, 0], sizes = [2, 32], strides = [1, 1]} : vector<2x128xf32> to vector<2x32xf32>
    %94 = arith.negf %93 : vector<2x32xf32>
    %95 = math.exp %94 : vector<2x32xf32>
    %cst_43 = arith.constant 1.000000e+00 : f32
    %96 = vector.broadcast %cst_43 : f32 to vector<2x32xf32>
    %97 = arith.addf %96, %95 : vector<2x32xf32>
    %98 = arith.divf %96, %97 : vector<2x32xf32>
    %99 = vector.extract_strided_slice %92 {offsets = [0, 32], sizes = [2, 32], strides = [1, 1]} : vector<2x128xf32> to vector<2x32xf32>
    %100 = arith.negf %99 : vector<2x32xf32>
    %101 = math.exp %100 : vector<2x32xf32>
    %cst_44 = arith.constant 1.000000e+00 : f32
    %102 = vector.broadcast %cst_44 : f32 to vector<2x32xf32>
    %103 = arith.addf %102, %101 : vector<2x32xf32>
    %104 = arith.divf %102, %103 : vector<2x32xf32>
    %105 = vector.extract_strided_slice %92 {offsets = [0, 64], sizes = [2, 32], strides = [1, 1]} : vector<2x128xf32> to vector<2x32xf32>
    %106 = math.tanh %105 : vector<2x32xf32>
    %107 = vector.extract_strided_slice %92 {offsets = [0, 96], sizes = [2, 32], strides = [1, 1]} : vector<2x128xf32> to vector<2x32xf32>
    %108 = arith.negf %107 : vector<2x32xf32>
    %109 = math.exp %108 : vector<2x32xf32>
    %cst_45 = arith.constant 1.000000e+00 : f32
    %110 = vector.broadcast %cst_45 : f32 to vector<2x32xf32>
    %111 = arith.addf %110, %109 : vector<2x32xf32>
    %112 = arith.divf %110, %111 : vector<2x32xf32>
    %c0_46 = arith.constant 0 : index
    %c0_47 = arith.constant 0 : index
    %113 = vector.load %arg5[%c0_46, %c0_47] : memref<2x32xf32, #tpu.memory_space<vmem>>, vector<2x32xf32>
    %114 = arith.mulf %104, %113 : vector<2x32xf32>
    %115 = arith.mulf %98, %106 : vector<2x32xf32>
    %116 = arith.addf %114, %115 : vector<2x32xf32>
    %117 = math.tanh %116 : vector<2x32xf32>
    %118 = arith.mulf %112, %117 : vector<2x32xf32>
    %c0_48 = arith.constant 0 : index
    %c0_49 = arith.constant 0 : index
    %119 = vector.load %arg5[%c0_48, %c0_49] : memref<2x32xf32, #tpu.memory_space<vmem>>, vector<2x32xf32>
    tpu.vector_store %arg5[%c0_48, %c0_49], %116 {strides = array<i32>} : memref<2x32xf32, #tpu.memory_space<vmem>>, vector<2x32xf32>,
    %c0_50 = arith.constant 0 : index
    %c0_51 = arith.constant 0 : index
    %120 = vector.load %arg4[%c0_50, %c0_51] : memref<2x32xf32, #tpu.memory_space<vmem>>, vector<2x32xf32>
    tpu.vector_store %arg4[%c0_50, %c0_51], %118 {strides = array<i32>} : memref<2x32xf32, #tpu.memory_space<vmem>>, vector<2x32xf32>,
    %121 = arith.truncf %118 : vector<2x32xf32> to vector<2x32xbf16>
    %122 = arith.index_cast %c2_i32 : i32 to index
    %c0_52 = arith.constant 0 : index
    %c0_53 = arith.constant 0 : index
    %123 = vector.load %arg3[%122, %c0_52, %c0_53] : memref<8x2x32xbf16, #tpu.memory_space<vmem>>, vector<1x2x32xbf16>
    %124 = vector.shape_cast %123 : vector<1x2x32xbf16> to vector<2x32xbf16>
    %125 = vector.shape_cast %121 : vector<2x32xbf16> to vector<1x2x32xbf16>
    tpu.vector_store %arg3[%122, %c0_52, %c0_53], %125 {strides = array<i32>} : memref<8x2x32xbf16, #tpu.memory_space<vmem>>, vector<1x2x32xbf16>,
    %c3_i32 = arith.constant 3 : i32
    %126 = arith.index_cast %c3_i32 : i32 to index
    %c0_54 = arith.constant 0 : index
    %c0_55 = arith.constant 0 : index
    %127 = vector.load %arg1[%126, %c0_54, %c0_55] : memref<8x2x128xf32, #tpu.memory_space<vmem>>, vector<1x2x128xf32>
    %128 = vector.shape_cast %127 : vector<1x2x128xf32> to vector<2x128xf32>
    %c0_56 = arith.constant 0 : index
    %c0_57 = arith.constant 0 : index
    %129 = vector.load %arg4[%c0_56, %c0_57] : memref<2x32xf32, #tpu.memory_space<vmem>>, vector<2x32xf32>
    %130 = arith.truncf %129 : vector<2x32xf32> to vector<2x32xbf16>
    %c0_58 = arith.constant 0 : index
    %c0_59 = arith.constant 0 : index
    %131 = vector.load %arg2[%c0_58, %c0_59] : memref<32x128xbf16, #tpu.memory_space<vmem>>, vector<32x128xbf16>
    %cst_60 = arith.constant dense<0.000000e+00> : vector<2x128xf32>
    %132 = tpu.matmul %130, %131, %cst_60 {dimension_numbers = #tpu.dot_dimension_numbers<[1], [0], [0], [1], [0, 0, 1, 1], [], []>} : vector<2x32xbf16>, vector<32x128xbf16>, vector<2x128xf32> -> vector<2x128xf32>
    %133 = arith.addf %128, %132 : vector<2x128xf32>
    %134 = vector.extract_strided_slice %133 {offsets = [0, 0], sizes = [2, 32], strides = [1, 1]} : vector<2x128xf32> to vector<2x32xf32>
    %135 = arith.negf %134 : vector<2x32xf32>
    %136 = math.exp %135 : vector<2x32xf32>
    %cst_61 = arith.constant 1.000000e+00 : f32
    %137 = vector.broadcast %cst_61 : f32 to vector<2x32xf32>
    %138 = arith.addf %137, %136 : vector<2x32xf32>
    %139 = arith.divf %137, %138 : vector<2x32xf32>
    %140 = vector.extract_strided_slice %133 {offsets = [0, 32], sizes = [2, 32], strides = [1, 1]} : vector<2x128xf32> to vector<2x32xf32>
    %141 = arith.negf %140 : vector<2x32xf32>
    %142 = math.exp %141 : vector<2x32xf32>
    %cst_62 = arith.constant 1.000000e+00 : f32
    %143 = vector.broadcast %cst_62 : f32 to vector<2x32xf32>
    %144 = arith.addf %143, %142 : vector<2x32xf32>
    %145 = arith.divf %143, %144 : vector<2x32xf32>
    %146 = vector.extract_strided_slice %133 {offsets = [0, 64], sizes = [2, 32], strides = [1, 1]} : vector<2x128xf32> to vector<2x32xf32>
    %147 = math.tanh %146 : vector<2x32xf32>
    %148 = vector.extract_strided_slice %133 {offsets = [0, 96], sizes = [2, 32], strides = [1, 1]} : vector<2x128xf32> to vector<2x32xf32>
    %149 = arith.negf %148 : vector<2x32xf32>
    %150 = math.exp %149 : vector<2x32xf32>
    %cst_63 = arith.constant 1.000000e+00 : f32
    %151 = vector.broadcast %cst_63 : f32 to vector<2x32xf32>
    %152 = arith.addf %151, %150 : vector<2x32xf32>
    %153 = arith.divf %151, %152 : vector<2x32xf32>
    %c0_64 = arith.constant 0 : index
    %c0_65 = arith.constant 0 : index
    %154 = vector.load %arg5[%c0_64, %c0_65] : memref<2x32xf32, #tpu.memory_space<vmem>>, vector<2x32xf32>
    %155 = arith.mulf %145, %154 : vector<2x32xf32>
    %156 = arith.mulf %139, %147 : vector<2x32xf32>
    %157 = arith.addf %155, %156 : vector<2x32xf32>
    %158 = math.tanh %157 : vector<2x32xf32>
    %159 = arith.mulf %153, %158 : vector<2x32xf32>
    %c0_66 = arith.constant 0 : index
    %c0_67 = arith.constant 0 : index
    %160 = vector.load %arg5[%c0_66, %c0_67] : memref<2x32xf32, #tpu.memory_space<vmem>>, vector<2x32xf32>
    tpu.vector_store %arg5[%c0_66, %c0_67], %157 {strides = array<i32>} : memref<2x32xf32, #tpu.memory_space<vmem>>, vector<2x32xf32>,
    %c0_68 = arith.constant 0 : index
    %c0_69 = arith.constant 0 : index
    %161 = vector.load %arg4[%c0_68, %c0_69] : memref<2x32xf32, #tpu.memory_space<vmem>>, vector<2x32xf32>
    tpu.vector_store %arg4[%c0_68, %c0_69], %159 {strides = array<i32>} : memref<2x32xf32, #tpu.memory_space<vmem>>, vector<2x32xf32>,
    %162 = arith.truncf %159 : vector<2x32xf32> to vector<2x32xbf16>
    %163 = arith.index_cast %c3_i32 : i32 to index
    %c0_70 = arith.constant 0 : index
    %c0_71 = arith.constant 0 : index
    %164 = vector.load %arg3[%163, %c0_70, %c0_71] : memref<8x2x32xbf16, #tpu.memory_space<vmem>>, vector<1x2x32xbf16>
    %165 = vector.shape_cast %164 : vector<1x2x32xbf16> to vector<2x32xbf16>
    %166 = vector.shape_cast %162 : vector<2x32xbf16> to vector<1x2x32xbf16>
    tpu.vector_store %arg3[%163, %c0_70, %c0_71], %166 {strides = array<i32>} : memref<8x2x32xbf16, #tpu.memory_space<vmem>>, vector<1x2x32xbf16>,
    %c4_i32 = arith.constant 4 : i32
    %167 = arith.index_cast %c4_i32 : i32 to index
    %c0_72 = arith.constant 0 : index
    %c0_73 = arith.constant 0 : index
    %168 = vector.load %arg1[%167, %c0_72, %c0_73] : memref<8x2x128xf32, #tpu.memory_space<vmem>>, vector<1x2x128xf32>
    %169 = vector.shape_cast %168 : vector<1x2x128xf32> to vector<2x128xf32>
    %c0_74 = arith.constant 0 : index
    %c0_75 = arith.constant 0 : index
    %170 = vector.load %arg4[%c0_74, %c0_75] : memref<2x32xf32, #tpu.memory_space<vmem>>, vector<2x32xf32>
    %171 = arith.truncf %170 : vector<2x32xf32> to vector<2x32xbf16>
    %c0_76 = arith.constant 0 : index
    %c0_77 = arith.constant 0 : index
    %172 = vector.load %arg2[%c0_76, %c0_77] : memref<32x128xbf16, #tpu.memory_space<vmem>>, vector<32x128xbf16>
    %cst_78 = arith.constant dense<0.000000e+00> : vector<2x128xf32>
    %173 = tpu.matmul %171, %172, %cst_78 {dimension_numbers = #tpu.dot_dimension_numbers<[1], [0], [0], [1], [0, 0, 1, 1], [], []>} : vector<2x32xbf16>, vector<32x128xbf16>, vector<2x128xf32> -> vector<2x128xf32>
    %174 = arith.addf %169, %173 : vector<2x128xf32>
    %175 = vector.extract_strided_slice %174 {offsets = [0, 0], sizes = [2, 32], strides = [1, 1]} : vector<2x128xf32> to vector<2x32xf32>
    %176 = arith.negf %175 : vector<2x32xf32>
    %177 = math.exp %176 : vector<2x32xf32>
    %cst_79 = arith.constant 1.000000e+00 : f32
    %178 = vector.broadcast %cst_79 : f32 to vector<2x32xf32>
    %179 = arith.addf %178, %177 : vector<2x32xf32>
    %180 = arith.divf %178, %179 : vector<2x32xf32>
    %181 = vector.extract_strided_slice %174 {offsets = [0, 32], sizes = [2, 32], strides = [1, 1]} : vector<2x128xf32> to vector<2x32xf32>
    %182 = arith.negf %181 : vector<2x32xf32>
    %183 = math.exp %182 : vector<2x32xf32>
    %cst_80 = arith.constant 1.000000e+00 : f32
    %184 = vector.broadcast %cst_80 : f32 to vector<2x32xf32>
    %185 = arith.addf %184, %183 : vector<2x32xf32>
    %186 = arith.divf %184, %185 : vector<2x32xf32>
    %187 = vector.extract_strided_slice %174 {offsets = [0, 64], sizes = [2, 32], strides = [1, 1]} : vector<2x128xf32> to vector<2x32xf32>
    %188 = math.tanh %187 : vector<2x32xf32>
    %189 = vector.extract_strided_slice %174 {offsets = [0, 96], sizes = [2, 32], strides = [1, 1]} : vector<2x128xf32> to vector<2x32xf32>
    %190 = arith.negf %189 : vector<2x32xf32>
    %191 = math.exp %190 : vector<2x32xf32>
    %cst_81 = arith.constant 1.000000e+00 : f32
    %192 = vector.broadcast %cst_81 : f32 to vector<2x32xf32>
    %193 = arith.addf %192, %191 : vector<2x32xf32>
    %194 = arith.divf %192, %193 : vector<2x32xf32>
    %c0_82 = arith.constant 0 : index
    %c0_83 = arith.constant 0 : index
    %195 = vector.load %arg5[%c0_82, %c0_83] : memref<2x32xf32, #tpu.memory_space<vmem>>, vector<2x32xf32>
    %196 = arith.mulf %186, %195 : vector<2x32xf32>
    %197 = arith.mulf %180, %188 : vector<2x32xf32>
    %198 = arith.addf %196, %197 : vector<2x32xf32>
    %199 = math.tanh %198 : vector<2x32xf32>
    %200 = arith.mulf %194, %199 : vector<2x32xf32>
    %c0_84 = arith.constant 0 : index
    %c0_85 = arith.constant 0 : index
    %201 = vector.load %arg5[%c0_84, %c0_85] : memref<2x32xf32, #tpu.memory_space<vmem>>, vector<2x32xf32>
    tpu.vector_store %arg5[%c0_84, %c0_85], %198 {strides = array<i32>} : memref<2x32xf32, #tpu.memory_space<vmem>>, vector<2x32xf32>,
    %c0_86 = arith.constant 0 : index
    %c0_87 = arith.constant 0 : index
    %202 = vector.load %arg4[%c0_86, %c0_87] : memref<2x32xf32, #tpu.memory_space<vmem>>, vector<2x32xf32>
    tpu.vector_store %arg4[%c0_86, %c0_87], %200 {strides = array<i32>} : memref<2x32xf32, #tpu.memory_space<vmem>>, vector<2x32xf32>,
    %203 = arith.truncf %200 : vector<2x32xf32> to vector<2x32xbf16>
    %204 = arith.index_cast %c4_i32 : i32 to index
    %c0_88 = arith.constant 0 : index
    %c0_89 = arith.constant 0 : index
    %205 = vector.load %arg3[%204, %c0_88, %c0_89] : memref<8x2x32xbf16, #tpu.memory_space<vmem>>, vector<1x2x32xbf16>
    %206 = vector.shape_cast %205 : vector<1x2x32xbf16> to vector<2x32xbf16>
    %207 = vector.shape_cast %203 : vector<2x32xbf16> to vector<1x2x32xbf16>
    tpu.vector_store %arg3[%204, %c0_88, %c0_89], %207 {strides = array<i32>} : memref<8x2x32xbf16, #tpu.memory_space<vmem>>, vector<1x2x32xbf16>,
    %c5_i32 = arith.constant 5 : i32
    %208 = arith.index_cast %c5_i32 : i32 to index
    %c0_90 = arith.constant 0 : index
    %c0_91 = arith.constant 0 : index
    %209 = vector.load %arg1[%208, %c0_90, %c0_91] : memref<8x2x128xf32, #tpu.memory_space<vmem>>, vector<1x2x128xf32>
    %210 = vector.shape_cast %209 : vector<1x2x128xf32> to vector<2x128xf32>
    %c0_92 = arith.constant 0 : index
    %c0_93 = arith.constant 0 : index
    %211 = vector.load %arg4[%c0_92, %c0_93] : memref<2x32xf32, #tpu.memory_space<vmem>>, vector<2x32xf32>
    %212 = arith.truncf %211 : vector<2x32xf32> to vector<2x32xbf16>
    %c0_94 = arith.constant 0 : index
    %c0_95 = arith.constant 0 : index
    %213 = vector.load %arg2[%c0_94, %c0_95] : memref<32x128xbf16, #tpu.memory_space<vmem>>, vector<32x128xbf16>
    %cst_96 = arith.constant dense<0.000000e+00> : vector<2x128xf32>
    %214 = tpu.matmul %212, %213, %cst_96 {dimension_numbers = #tpu.dot_dimension_numbers<[1], [0], [0], [1], [0, 0, 1, 1], [], []>} : vector<2x32xbf16>, vector<32x128xbf16>, vector<2x128xf32> -> vector<2x128xf32>
    %215 = arith.addf %210, %214 : vector<2x128xf32>
    %216 = vector.extract_strided_slice %215 {offsets = [0, 0], sizes = [2, 32], strides = [1, 1]} : vector<2x128xf32> to vector<2x32xf32>
    %217 = arith.negf %216 : vector<2x32xf32>
    %218 = math.exp %217 : vector<2x32xf32>
    %cst_97 = arith.constant 1.000000e+00 : f32
    %219 = vector.broadcast %cst_97 : f32 to vector<2x32xf32>
    %220 = arith.addf %219, %218 : vector<2x32xf32>
    %221 = arith.divf %219, %220 : vector<2x32xf32>
    %222 = vector.extract_strided_slice %215 {offsets = [0, 32], sizes = [2, 32], strides = [1, 1]} : vector<2x128xf32> to vector<2x32xf32>
    %223 = arith.negf %222 : vector<2x32xf32>
    %224 = math.exp %223 : vector<2x32xf32>
    %cst_98 = arith.constant 1.000000e+00 : f32
    %225 = vector.broadcast %cst_98 : f32 to vector<2x32xf32>
    %226 = arith.addf %225, %224 : vector<2x32xf32>
    %227 = arith.divf %225, %226 : vector<2x32xf32>
    %228 = vector.extract_strided_slice %215 {offsets = [0, 64], sizes = [2, 32], strides = [1, 1]} : vector<2x128xf32> to vector<2x32xf32>
    %229 = math.tanh %228 : vector<2x32xf32>
    %230 = vector.extract_strided_slice %215 {offsets = [0, 96], sizes = [2, 32], strides = [1, 1]} : vector<2x128xf32> to vector<2x32xf32>
    %231 = arith.negf %230 : vector<2x32xf32>
    %232 = math.exp %231 : vector<2x32xf32>
    %cst_99 = arith.constant 1.000000e+00 : f32
    %233 = vector.broadcast %cst_99 : f32 to vector<2x32xf32>
    %234 = arith.addf %233, %232 : vector<2x32xf32>
    %235 = arith.divf %233, %234 : vector<2x32xf32>
    %c0_100 = arith.constant 0 : index
    %c0_101 = arith.constant 0 : index
    %236 = vector.load %arg5[%c0_100, %c0_101] : memref<2x32xf32, #tpu.memory_space<vmem>>, vector<2x32xf32>
    %237 = arith.mulf %227, %236 : vector<2x32xf32>
    %238 = arith.mulf %221, %229 : vector<2x32xf32>
    %239 = arith.addf %237, %238 : vector<2x32xf32>
    %240 = math.tanh %239 : vector<2x32xf32>
    %241 = arith.mulf %235, %240 : vector<2x32xf32>
    %c0_102 = arith.constant 0 : index
    %c0_103 = arith.constant 0 : index
    %242 = vector.load %arg5[%c0_102, %c0_103] : memref<2x32xf32, #tpu.memory_space<vmem>>, vector<2x32xf32>
    tpu.vector_store %arg5[%c0_102, %c0_103], %239 {strides = array<i32>} : memref<2x32xf32, #tpu.memory_space<vmem>>, vector<2x32xf32>,
    %c0_104 = arith.constant 0 : index
    %c0_105 = arith.constant 0 : index
    %243 = vector.load %arg4[%c0_104, %c0_105] : memref<2x32xf32, #tpu.memory_space<vmem>>, vector<2x32xf32>
    tpu.vector_store %arg4[%c0_104, %c0_105], %241 {strides = array<i32>} : memref<2x32xf32, #tpu.memory_space<vmem>>, vector<2x32xf32>,
    %244 = arith.truncf %241 : vector<2x32xf32> to vector<2x32xbf16>
    %245 = arith.index_cast %c5_i32 : i32 to index
    %c0_106 = arith.constant 0 : index
    %c0_107 = arith.constant 0 : index
    %246 = vector.load %arg3[%245, %c0_106, %c0_107] : memref<8x2x32xbf16, #tpu.memory_space<vmem>>, vector<1x2x32xbf16>
    %247 = vector.shape_cast %246 : vector<1x2x32xbf16> to vector<2x32xbf16>
    %248 = vector.shape_cast %244 : vector<2x32xbf16> to vector<1x2x32xbf16>
    tpu.vector_store %arg3[%245, %c0_106, %c0_107], %248 {strides = array<i32>} : memref<8x2x32xbf16, #tpu.memory_space<vmem>>, vector<1x2x32xbf16>,
    %c6_i32 = arith.constant 6 : i32
    %249 = arith.index_cast %c6_i32 : i32 to index
    %c0_108 = arith.constant 0 : index
    %c0_109 = arith.constant 0 : index
    %250 = vector.load %arg1[%249, %c0_108, %c0_109] : memref<8x2x128xf32, #tpu.memory_space<vmem>>, vector<1x2x128xf32>
    %251 = vector.shape_cast %250 : vector<1x2x128xf32> to vector<2x128xf32>
    %c0_110 = arith.constant 0 : index
    %c0_111 = arith.constant 0 : index
    %252 = vector.load %arg4[%c0_110, %c0_111] : memref<2x32xf32, #tpu.memory_space<vmem>>, vector<2x32xf32>
    %253 = arith.truncf %252 : vector<2x32xf32> to vector<2x32xbf16>
    %c0_112 = arith.constant 0 : index
    %c0_113 = arith.constant 0 : index
    %254 = vector.load %arg2[%c0_112, %c0_113] : memref<32x128xbf16, #tpu.memory_space<vmem>>, vector<32x128xbf16>
    %cst_114 = arith.constant dense<0.000000e+00> : vector<2x128xf32>
    %255 = tpu.matmul %253, %254, %cst_114 {dimension_numbers = #tpu.dot_dimension_numbers<[1], [0], [0], [1], [0, 0, 1, 1], [], []>} : vector<2x32xbf16>, vector<32x128xbf16>, vector<2x128xf32> -> vector<2x128xf32>
    %256 = arith.addf %251, %255 : vector<2x128xf32>
    %257 = vector.extract_strided_slice %256 {offsets = [0, 0], sizes = [2, 32], strides = [1, 1]} : vector<2x128xf32> to vector<2x32xf32>
    %258 = arith.negf %257 : vector<2x32xf32>
    %259 = math.exp %258 : vector<2x32xf32>
    %cst_115 = arith.constant 1.000000e+00 : f32
    %260 = vector.broadcast %cst_115 : f32 to vector<2x32xf32>
    %261 = arith.addf %260, %259 : vector<2x32xf32>
    %262 = arith.divf %260, %261 : vector<2x32xf32>
    %263 = vector.extract_strided_slice %256 {offsets = [0, 32], sizes = [2, 32], strides = [1, 1]} : vector<2x128xf32> to vector<2x32xf32>
    %264 = arith.negf %263 : vector<2x32xf32>
    %265 = math.exp %264 : vector<2x32xf32>
    %cst_116 = arith.constant 1.000000e+00 : f32
    %266 = vector.broadcast %cst_116 : f32 to vector<2x32xf32>
    %267 = arith.addf %266, %265 : vector<2x32xf32>
    %268 = arith.divf %266, %267 : vector<2x32xf32>
    %269 = vector.extract_strided_slice %256 {offsets = [0, 64], sizes = [2, 32], strides = [1, 1]} : vector<2x128xf32> to vector<2x32xf32>
    %270 = math.tanh %269 : vector<2x32xf32>
    %271 = vector.extract_strided_slice %256 {offsets = [0, 96], sizes = [2, 32], strides = [1, 1]} : vector<2x128xf32> to vector<2x32xf32>
    %272 = arith.negf %271 : vector<2x32xf32>
    %273 = math.exp %272 : vector<2x32xf32>
    %cst_117 = arith.constant 1.000000e+00 : f32
    %274 = vector.broadcast %cst_117 : f32 to vector<2x32xf32>
    %275 = arith.addf %274, %273 : vector<2x32xf32>
    %276 = arith.divf %274, %275 : vector<2x32xf32>
    %c0_118 = arith.constant 0 : index
    %c0_119 = arith.constant 0 : index
    %277 = vector.load %arg5[%c0_118, %c0_119] : memref<2x32xf32, #tpu.memory_space<vmem>>, vector<2x32xf32>
    %278 = arith.mulf %268, %277 : vector<2x32xf32>
    %279 = arith.mulf %262, %270 : vector<2x32xf32>
    %280 = arith.addf %278, %279 : vector<2x32xf32>
    %281 = math.tanh %280 : vector<2x32xf32>
    %282 = arith.mulf %276, %281 : vector<2x32xf32>
    %c0_120 = arith.constant 0 : index
    %c0_121 = arith.constant 0 : index
    %283 = vector.load %arg5[%c0_120, %c0_121] : memref<2x32xf32, #tpu.memory_space<vmem>>, vector<2x32xf32>
    tpu.vector_store %arg5[%c0_120, %c0_121], %280 {strides = array<i32>} : memref<2x32xf32, #tpu.memory_space<vmem>>, vector<2x32xf32>,
    %c0_122 = arith.constant 0 : index
    %c0_123 = arith.constant 0 : index
    %284 = vector.load %arg4[%c0_122, %c0_123] : memref<2x32xf32, #tpu.memory_space<vmem>>, vector<2x32xf32>
    tpu.vector_store %arg4[%c0_122, %c0_123], %282 {strides = array<i32>} : memref<2x32xf32, #tpu.memory_space<vmem>>, vector<2x32xf32>,
    %285 = arith.truncf %282 : vector<2x32xf32> to vector<2x32xbf16>
    %286 = arith.index_cast %c6_i32 : i32 to index
    %c0_124 = arith.constant 0 : index
    %c0_125 = arith.constant 0 : index
    %287 = vector.load %arg3[%286, %c0_124, %c0_125] : memref<8x2x32xbf16, #tpu.memory_space<vmem>>, vector<1x2x32xbf16>
    %288 = vector.shape_cast %287 : vector<1x2x32xbf16> to vector<2x32xbf16>
    %289 = vector.shape_cast %285 : vector<2x32xbf16> to vector<1x2x32xbf16>
    tpu.vector_store %arg3[%286, %c0_124, %c0_125], %289 {strides = array<i32>} : memref<8x2x32xbf16, #tpu.memory_space<vmem>>, vector<1x2x32xbf16>,
    %c7_i32 = arith.constant 7 : i32
    %290 = arith.index_cast %c7_i32 : i32 to index
    %c0_126 = arith.constant 0 : index
    %c0_127 = arith.constant 0 : index
    %291 = vector.load %arg1[%290, %c0_126, %c0_127] : memref<8x2x128xf32, #tpu.memory_space<vmem>>, vector<1x2x128xf32>
    %292 = vector.shape_cast %291 : vector<1x2x128xf32> to vector<2x128xf32>
    %c0_128 = arith.constant 0 : index
    %c0_129 = arith.constant 0 : index
    %293 = vector.load %arg4[%c0_128, %c0_129] : memref<2x32xf32, #tpu.memory_space<vmem>>, vector<2x32xf32>
    %294 = arith.truncf %293 : vector<2x32xf32> to vector<2x32xbf16>
    %c0_130 = arith.constant 0 : index
    %c0_131 = arith.constant 0 : index
    %295 = vector.load %arg2[%c0_130, %c0_131] : memref<32x128xbf16, #tpu.memory_space<vmem>>, vector<32x128xbf16>
    %cst_132 = arith.constant dense<0.000000e+00> : vector<2x128xf32>
    %296 = tpu.matmul %294, %295, %cst_132 {dimension_numbers = #tpu.dot_dimension_numbers<[1], [0], [0], [1], [0, 0, 1, 1], [], []>} : vector<2x32xbf16>, vector<32x128xbf16>, vector<2x128xf32> -> vector<2x128xf32>
    %297 = arith.addf %292, %296 : vector<2x128xf32>
    %298 = vector.extract_strided_slice %297 {offsets = [0, 0], sizes = [2, 32], strides = [1, 1]} : vector<2x128xf32> to vector<2x32xf32>
    %299 = arith.negf %298 : vector<2x32xf32>
    %300 = math.exp %299 : vector<2x32xf32>
    %cst_133 = arith.constant 1.000000e+00 : f32
    %301 = vector.broadcast %cst_133 : f32 to vector<2x32xf32>
    %302 = arith.addf %301, %300 : vector<2x32xf32>
    %303 = arith.divf %301, %302 : vector<2x32xf32>
    %304 = vector.extract_strided_slice %297 {offsets = [0, 32], sizes = [2, 32], strides = [1, 1]} : vector<2x128xf32> to vector<2x32xf32>
    %305 = arith.negf %304 : vector<2x32xf32>
    %306 = math.exp %305 : vector<2x32xf32>
    %cst_134 = arith.constant 1.000000e+00 : f32
    %307 = vector.broadcast %cst_134 : f32 to vector<2x32xf32>
    %308 = arith.addf %307, %306 : vector<2x32xf32>
    %309 = arith.divf %307, %308 : vector<2x32xf32>
    %310 = vector.extract_strided_slice %297 {offsets = [0, 64], sizes = [2, 32], strides = [1, 1]} : vector<2x128xf32> to vector<2x32xf32>
    %311 = math.tanh %310 : vector<2x32xf32>
    %312 = vector.extract_strided_slice %297 {offsets = [0, 96], sizes = [2, 32], strides = [1, 1]} : vector<2x128xf32> to vector<2x32xf32>
    %313 = arith.negf %312 : vector<2x32xf32>
    %314 = math.exp %313 : vector<2x32xf32>
    %cst_135 = arith.constant 1.000000e+00 : f32
    %315 = vector.broadcast %cst_135 : f32 to vector<2x32xf32>
    %316 = arith.addf %315, %314 : vector<2x32xf32>
    %317 = arith.divf %315, %316 : vector<2x32xf32>
    %c0_136 = arith.constant 0 : index
    %c0_137 = arith.constant 0 : index
    %318 = vector.load %arg5[%c0_136, %c0_137] : memref<2x32xf32, #tpu.memory_space<vmem>>, vector<2x32xf32>
    %319 = arith.mulf %309, %318 : vector<2x32xf32>
    %320 = arith.mulf %303, %311 : vector<2x32xf32>
    %321 = arith.addf %319, %320 : vector<2x32xf32>
    %322 = math.tanh %321 : vector<2x32xf32>
    %323 = arith.mulf %317, %322 : vector<2x32xf32>
    %c0_138 = arith.constant 0 : index
    %c0_139 = arith.constant 0 : index
    %324 = vector.load %arg5[%c0_138, %c0_139] : memref<2x32xf32, #tpu.memory_space<vmem>>, vector<2x32xf32>
    tpu.vector_store %arg5[%c0_138, %c0_139], %321 {strides = array<i32>} : memref<2x32xf32, #tpu.memory_space<vmem>>, vector<2x32xf32>,
    %c0_140 = arith.constant 0 : index
    %c0_141 = arith.constant 0 : index
    %325 = vector.load %arg4[%c0_140, %c0_141] : memref<2x32xf32, #tpu.memory_space<vmem>>, vector<2x32xf32>
    tpu.vector_store %arg4[%c0_140, %c0_141], %323 {strides = array<i32>} : memref<2x32xf32, #tpu.memory_space<vmem>>, vector<2x32xf32>,
    %326 = arith.truncf %323 : vector<2x32xf32> to vector<2x32xbf16>
    %327 = arith.index_cast %c7_i32 : i32 to index
    %c0_142 = arith.constant 0 : index
    %c0_143 = arith.constant 0 : index
    %328 = vector.load %arg3[%327, %c0_142, %c0_143] : memref<8x2x32xbf16, #tpu.memory_space<vmem>>, vector<1x2x32xbf16>
    %329 = vector.shape_cast %328 : vector<1x2x32xbf16> to vector<2x32xbf16>
    %330 = vector.shape_cast %326 : vector<2x32xbf16> to vector<1x2x32xbf16>
    tpu.vector_store %arg3[%327, %c0_142, %c0_143], %330 {strides = array<i32>} : memref<8x2x32xbf16, #tpu.memory_space<vmem>>, vector<1x2x32xbf16>,
    %c8_i32 = arith.constant 8 : i32
    return
  }
  func.func @transform_0(%arg0: i32) -> (i32, i32, i32) {
    %c0_i32 = arith.constant 0 : i32
    %c0_i32_0 = arith.constant 0 : i32
    %c0_i32_1 = arith.constant 0 : i32
    return %arg0, %c0_i32, %c0_i32_0 : i32, i32, i32
  }
  func.func @transform_1(%arg0: i32) -> (i32, i32) {
    %c0_i32 = arith.constant 0 : i32
    %c0_i32_0 = arith.constant 0 : i32
    %c0_i32_1 = arith.constant 0 : i32
    return %c0_i32, %c0_i32_0 : i32, i32
  }
  func.func @transform_2(%arg0: i32) -> (i32, i32, i32) {
    %c0_i32 = arith.constant 0 : i32
    %c0_i32_0 = arith.constant 0 : i32
    %c0_i32_1 = arith.constant 0 : i32
    return %arg0, %c0_i32, %c0_i32_0 : i32, i32, i32
  }
}

</mosaic_0001>

<bundles_post_ra>
// kernel: decoder_rnn_forward.3
= control target key start
LH: loop header
LB: loop body
LE: loop exit
PB: predicated region body
PF: predicated region fallthrough
CT: control target
= control target key end

     0   :  { %v157_v1 = vmov 0.0   ;;  %vm158_vm0 = vmmov 0   ;;  %s206_s0 = inlined_call_operand.vmem [shape: bf16[16,32], index: 0, kind: input, shape index: {}]   ;;  %s207_s1 = inlined_call_operand.vmem [shape: bf16[32,128], index: 1, kind: input, shape index: {}]   ;;  %s208_s2 = inlined_call_operand.vmem [shape: f32[1,128], index: 2, kind: input, shape index: {}]   ;;  %s209_s3 = inlined_call_operand.hbm [shape: f32[16,128], index: 3, kind: output, shape index: {}]  }
   0x1   :  { %v130_v0 = vld [vmem:[%s207_s1] sm:$0xff]   ;;  %117 = vmatprep.subr.bf16.mxu0 %v157_v1  ;;  %v131_v2 = vld [vmem:[%s207_s1 + $0x8] sm:$0xff]   ;;  %121 = vmatprep.mubr.msk.bf16.mxu0 %vm158_vm0, %v157_v1 }
   0x2   :  { %118 = vmatpush3.bf16.msra.mxu0 %v130_v0 }
   0x3   :  { %119 = vmatprep.subr.bf16.mxu0 %v157_v1 }
   0x4   :  { %8 = vsyncpa [#allocation3], 0  ;;  %v132_v3 = vld [vmem:[%s206_s0] sm:$0xff]   ;;  %vm46_vm1 = vcmask 261120   ;;  %s159_s20 = smov [#allocation2]  }
   0x5   :  { %v109_v4 = vld [vmem:[%s208_s2] ss:$0 sm:$0xff]  ;;  %s98_s21 = sshll.u32 %s159_s20, 4  ;;  %s99_s21 = int_to_ptr.vmem [resolvable:$true] %s98_s21 }
   0x6   :  { %120 = vmatpush3.bf16.msra.mxu0 %v131_v2  ;;  %s133_s1 = scalar_lea.vmem %s99_s21, 256  ;;  %p138_p1 = scmp.lt.s32.totalorder %s99_s21, %s99_s21 }
   0x7   :  { %p134_p0 = scmp.ne.s32.totalorder %s99_s21, %s133_s1  ;;  %p139_p2 = scmp.lt.s32.totalorder %s133_s1, %s133_s1 }
   0x9   :  { %122 = vmatmul.mubr.msk.bf16.vlgmr.msra.gmra.mrb[0].mxu0 %vm46_vm1, %v132_v3  ;;  %p140_p3 = por %p139_p2, %p138_p1 }
   0xb   :  { %p141_p4 = pnand %p140_p3, %p134_p0 }
  0xdc   :  { %v84_v5 = vpop.f32.mrb[0].mxu0 }
  0xdd   :  { %v85_v6 = vadd.f32 %v109_v4, %v84_v5  ;;  %v123_v7 = vpop.f32.mrb[1].mxu0 }
  0xde   :  { %v87_v8 = vpop.f32.mrb[2].mxu0 }
  0xdf   :  { %91 = vst [vmem:[#allocation2] sm:$0xff] %v85_v6  ;;  %v88_v9 = vadd.f32 %v109_v4, %v87_v8  ;;  %v124_v10 = vpop.f32.mrb[3].mxu0 }
  0xe1   :  { %92 = vst [vmem:[#allocation2 + $0x8] sm:$0xff] %v88_v9 }
  0xe2   :  { %144 = shalt.err (!%p141_p4)
}
  0xe3   :  { %s145_s22 = scalar_lea.hbm %s209_s3, 256 }
  0xe4   :  { %p146_p5 = scmp.ne.s32.totalorder %s209_s3, %s145_s22  ;;  %p149_p6 = scmp.lt.u32.totalorder %s145_s22, %s209_s3 }
  0xe6   :  { %p151_p7 = pnand %p149_p6, %p146_p5 }
  0xe8   :  { %154 = shalt.err (!%p151_p7)
}
  0xe9   :  { %s160_s27 = smov 128   ;;  %s161_s28 = smov 8  }
  0xea   :  { %104 = dma.vmem_to_hbm [thread:$0]  %s99_s21, 256, %s209_s3, [#allocation3], %s160_s27, %s160_s27, %s161_s28  }
  0xeb   :  { %155 = dma.done.wait [#allocation3], 256  }
  0xec   :  { %156 = vsyncadd [#allocation3], 4294967040 }
  0xed   :  { %108 = vsyncpa [#allocation3], 1 }

// kernel: decoder_rnn_forward.2
= control target key start
LH: loop header
LB: loop body
LE: loop exit
PB: predicated region body
PF: predicated region fallthrough
CT: control target
= control target key end

     0   :  { %vm16_vm0 = vcmask 254976   ;;  %v1236_v0 = vmov 0.0   ;;  %vm1237_vm1 = vmmov 0   ;;  %vm38_vm2 = vcmask 261120   ;;  %s1238_s15 = smov 64   ;;  %s1239_s16 = smov 32   ;;  %s1507_s1 = inlined_call_operand.vmem [shape: bf16[32,128], index: 1, kind: input, shape index: {}]   ;;  %s1508_s0 = inlined_call_operand.vmem [shape: f32[8,2,128], index: 0, kind: input, shape index: {}]   ;;  %s1509_s2 = inlined_call_operand.vmem [shape: bf16[8,2,32], index: 2, kind: output, shape index: {}]  }
   0x1   :  { %1086 = vmatprep.subr.bf16.mxu0 %v1236_v0  ;;  %v1156_v1 = vld [vmem:[%s1507_s1] sm:$0xff]   ;;  %1090 = vmatprep.mubr.msk.bf16.mxu0 %vm1237_vm1, %v1236_v0  ;;  %17 = vst.msk [vmem:[#allocation2] sm:$0x3] %vm16_vm0, %v1236_v0  ;;  %18 = vst.msk [vmem:[#allocation3] sm:$0x3] %vm16_vm0, %v1236_v0  ;;  %v1157_v2 = vld [vmem:[%s1507_s1 + $0x8] sm:$0xff]  }
   0x2   :  { %1094 = vmatprep.subr.bf16.mxu1 %v1236_v0  ;;  %1098 = vmatprep.mubr.msk.bf16.mxu1 %vm1237_vm1, %v1236_v0  ;;  %v19_v5 = vld [vmem:[%s1508_s0] sm:$0x3]  ;;  %s1240_s17 = smov 96   ;;  %v1159_v25 = vld [vmem:[%s1507_s1 + $0x8] sm:$0xff]   ;;  %v1020_v33 = vld [vmem:[%s1508_s0 + $0x2] sm:$0x3] }
   0x3   :  { %1087 = vmatpush3.bf16.msra.mxu0 %v1156_v1  ;;  %v1158_v24 = vld [vmem:[%s1507_s1] sm:$0xff]   ;;  %v1161_v52 = vld [vmem:[%s1507_s1 + $0x8] sm:$0xff]   ;;  %vm142_vm3 = vcmask 253952  }
   0x4   :  { %1088 = vmatprep.subr.bf16.mxu0 %v1236_v0  ;;  %1095 = vmatpush3.bf16.msra.mxu1 %v1158_v24  ;;  %v1160_v51 = vld [vmem:[%s1507_s1] sm:$0xff]  }
   0x5   :  { %1096 = vmatprep.subr.bf16.mxu1 %v1236_v0  ;;  %v1026_v60 = vld [vmem:[%s1508_s0 + $0x4] sm:$0x3]  ;;  %v1032_v24 = vld [vmem:[%s1508_s0 + $0x6] sm:$0x3] }
   0x7   :  { %1089 = vmatpush3.bf16.msra.mxu0 %v1157_v2 }
   0x8   :  { %v20_v3 = vld [vmem:[#allocation2] sm:$0x3]  ;;  %1102 = vmatprep.subr.bf16.mxu0 %v1236_v0  ;;  %v90_v12 = vld [vmem:[#allocation3] sm:$0x3]  ;;  %1097 = vmatpush3.bf16.msra.mxu1 %v1159_v25 }
   0x9   :  { %v21_v4 = vpack.c.bf16 %v20_v3, %v20_v3  ;;  %1110 = vmatprep.subr.bf16.mxu1 %v1236_v0 }
   0xb   :  { %1091 = vmatmul.mubr.msk.bf16.vlgmr.msra.gmra.mrb[0].mxu0 %vm38_vm2, %v21_v4 }
   0xc   :  { %1106 = vmatprep.mubr.msk.bf16.mxu0 %vm1237_vm1, %v1236_v0  ;;  %1103 = vmatpush3.bf16.msra.mxu0 %v1160_v51 }
   0xd   :  { %1104 = vmatprep.subr.bf16.mxu0 %v1236_v0 }
  0x10   :  { %1105 = vmatpush3.bf16.msra.mxu0 %v1161_v52  ;;  %v1038_v52 = vld [vmem:[%s1508_s0 + $0x8] sm:$0x3] }
  0x11   :  { %1118 = vmatprep.subr.bf16.mxu0 %v1236_v0 }
  0xde   :  { %v76_v6 = vpop.f32.mrb[0].mxu0 }
  0xdf   :  { %v82_v7 = vadd.f32 %v76_v6, %v19_v5  ;;  %v1092_v8 = vpop.f32.mrb[1].mxu0 }
  0xe0   :  { %v79_v9 = vpop.f32.mrb[2].mxu0 }
  0xe1   :  { %1172 = vtanh.f32 %v82_v7  ;;  %v1093_v10 = vpop.f32.mrb[3].mxu0  ;;  %v1019_v13 = vmul.f32 -1.442695, %v82_v7 }
  0xe3   :  { %1174 = vpow2.f32 %v1019_v13 }
  0xeb   :  { %v1173_v11 = vpop.eup %1172 }
  0xec   :  { %97 = vrot.lane.b32.xlu0 %v1173_v11, %s1238_s15 }
  0xed   :  { %v1175_v14 = vpop.eup %1174 }
  0xee   :  { %v86_v15 = vadd.f32 1.0, %v1175_v14 }
  0xf0   :  { %92 = vrot.lane.b32.xlu0 %v90_v12, %s1239_s16  ;;  %1176 = vrcp.f32 %v86_v15  ;;  %v1162_v15 = vld [vmem:[%s1507_s1] sm:$0xff]  }
  0xfa   :  { %v1177_v16 = vpop.eup %1176 }
 0x15e   :  { %v98_v17 = vpop.permute.xlu0 %97 }
 0x15f   :  { %v100_v18 = vmul.f32 %v1177_v16, %v98_v17 }
 0x161   :  { %102 = vrot.lane.b32.xlu1 %v100_v18, %s1239_s16 }
 0x162   :  { %v93_v19 = vpop.permute.xlu0 %92 }
 0x163   :  { %v95_v20 = vmul.f32 %v1177_v16, %v93_v19 }
 0x1d3   :  { %v103_v21 = vpop.permute.xlu1 %102 }
 0x1d4   :  { %v105_v22 = vadd.f32 %v103_v21, %v95_v20 }
 0x1d6   :  { %1178 = vtanh.f32 %v105_v22 }
 0x1e0   :  { %v1179_v23 = vpop.eup %1178 }
 0x1e1   :  { %108 = vrot.lane.b32.xlu1 %v1179_v23, %s1238_s15 }
 0x1e5   :  { %113 = vrot.lane.b32.xlu1 %v105_v22, %s1240_s17 }
 0x253   :  { %v109_v26 = vpop.permute.xlu1 %108 }
 0x254   :  { %v1294_v27 = vmul.f32 %v1177_v16, %v109_v26  ;;  %v1163_v16 = vld [vmem:[%s1507_s1 + $0x8] sm:$0xff]  }
 0x256   :  { %119 = vrot.lane.b32.xlu0 %v1294_v27, %s1239_s16 }
 0x257   :  { %v114_v28 = vpop.permute.xlu1 %113 }
 0x258   :  { %117 = vst.msk [vmem:[#allocation3] sm:$0x3] %vm16_vm0, %v114_v28 }
 0x25f   :  { %v215_v29 = vld [vmem:[#allocation3] sm:$0x3] }
 0x260   :  { %217 = vrot.lane.b32.xlu1 %v215_v29, %s1239_s16 }
 0x2c8   :  { %v120_v30 = vpop.permute.xlu0 %119 }
 0x2c9   :  { %122 = vst.msk [vmem:[#allocation2] sm:$0x3] %vm16_vm0, %v120_v30 }
 0x2d0   :  { %v146_v31 = vld [vmem:[#allocation2] sm:$0x3] }
 0x2d1   :  { %v147_v32 = vpack.c.bf16 %v146_v31, %v146_v31 }
 0x2d2   :  { %v218_v46 = vpop.permute.xlu1 %217 }
 0x2d3   :  { %1099 = vmatmul.mubr.msk.bf16.vlgmr.msra.gmra.mrb[0].mxu1 %vm38_vm2, %v147_v32 }
 0x2d4   :  { %1114 = vmatprep.mubr.msk.bf16.mxu1 %vm1237_vm1, %v1236_v0  ;;  %1111 = vmatpush3.bf16.msra.mxu1 %v1162_v15 }
 0x2d5   :  { %1112 = vmatprep.subr.bf16.mxu1 %v1236_v0 }
 0x2d8   :  { %1113 = vmatpush3.bf16.msra.mxu1 %v1163_v16 }
 0x2d9   :  { %1126 = vmatprep.subr.bf16.mxu1 %v1236_v0 }
 0x3a6   :  { %v201_v34 = vpop.f32.mrb[0].mxu1 }
 0x3a7   :  { %v207_v35 = vadd.f32 %v1020_v33, %v201_v34  ;;  %v1100_v36 = vpop.f32.mrb[1].mxu1 }
 0x3a8   :  { %v204_v37 = vpop.f32.mrb[2].mxu1 }
 0x3a9   :  { %1180 = vtanh.f32 %v207_v35  ;;  %v1101_v38 = vpop.f32.mrb[3].mxu1  ;;  %v1024_v40 = vmul.f32 -1.442695, %v207_v35 }
 0x3ab   :  { %1182 = vpow2.f32 %v1024_v40 }
 0x3b3   :  { %v1181_v39 = vpop.eup %1180 }
 0x3b4   :  { %222 = vrot.lane.b32.xlu0 %v1181_v39, %s1238_s15 }
 0x3b5   :  { %v1183_v41 = vpop.eup %1182 }
 0x3b6   :  { %v211_v42 = vadd.f32 1.0, %v1183_v41 }
 0x3b8   :  { %1184 = vrcp.f32 %v211_v42 }
 0x3c2   :  { %v1185_v43 = vpop.eup %1184 }
 0x3c3   :  { %v220_v47 = vmul.f32 %v1185_v43, %v218_v46 }
 0x426   :  { %v223_v44 = vpop.permute.xlu0 %222 }
 0x427   :  { %v225_v45 = vmul.f32 %v1185_v43, %v223_v44  ;;  %v1165_v44 = vld [vmem:[%s1507_s1 + $0x8] sm:$0xff]  }
 0x429   :  { %227 = vrot.lane.b32.xlu0 %v225_v45, %s1239_s16 }
 0x49b   :  { %v228_v48 = vpop.permute.xlu0 %227 }
 0x49c   :  { %v230_v49 = vadd.f32 %v228_v48, %v220_v47 }
 0x49e   :  { %1186 = vtanh.f32 %v230_v49 }
 0x4a8   :  { %v1187_v50 = vpop.eup %1186 }
 0x4a9   :  { %233 = vrot.lane.b32.xlu1 %v1187_v50, %s1238_s15 }
 0x4ad   :  { %238 = vrot.lane.b32.xlu1 %v230_v49, %s1240_s17 }
 0x51b   :  { %v234_v53 = vpop.permute.xlu1 %233 }
 0x51c   :  { %v1319_v54 = vmul.f32 %v1185_v43, %v234_v53  ;;  %v1164_v43 = vld [vmem:[%s1507_s1] sm:$0xff]  }
 0x51e   :  { %243 = vrot.lane.b32.xlu0 %v1319_v54, %s1239_s16 }
 0x51f   :  { %v239_v55 = vpop.permute.xlu1 %238 }
 0x520   :  { %241 = vst.msk [vmem:[#allocation3] sm:$0x3] %vm16_vm0, %v239_v55 }
 0x527   :  { %v339_v56 = vld [vmem:[#allocation3] sm:$0x3] }
 0x528   :  { %341 = vrot.lane.b32.xlu1 %v339_v56, %s1239_s16 }
 0x590   :  { %v244_v57 = vpop.permute.xlu0 %243 }
 0x591   :  { %246 = vst.msk [vmem:[#allocation2] sm:$0x3] %vm16_vm0, %v244_v57 }
 0x598   :  { %v270_v58 = vld [vmem:[#allocation2] sm:$0x3] }
 0x599   :  { %v271_v59 = vpack.c.bf16 %v270_v58, %v270_v58 }
 0x59a   :  { %v342_v10 = vpop.permute.xlu1 %341 }
 0x59b   :  { %1107 = vmatmul.mubr.msk.bf16.vlgmr.msra.gmra.mrb[4].mxu0 %vm38_vm2, %v271_v59 }
 0x59c   :  { %1122 = vmatprep.mubr.msk.bf16.mxu0 %vm1237_vm1, %v1236_v0  ;;  %1119 = vmatpush3.bf16.msra.mxu0 %v1164_v43 }
 0x59d   :  { %1120 = vmatprep.subr.bf16.mxu0 %v1236_v0 }
 0x5a0   :  { %1121 = vmatpush3.bf16.msra.mxu0 %v1165_v44 }
 0x5a1   :  { %1134 = vmatprep.subr.bf16.mxu0 %v1236_v0 }
 0x66e   :  { %v325_v61 = vpop.f32.mrb[4].mxu0 }
 0x66f   :  { %v331_v62 = vadd.f32 %v1026_v60, %v325_v61  ;;  %v1108_v63 = vpop.f32.mrb[5].mxu0 }
 0x670   :  { %v328_v1 = vpop.f32.mrb[6].mxu0 }
 0x671   :  { %1188 = vtanh.f32 %v331_v62  ;;  %v1109_v2 = vpop.f32.mrb[7].mxu0  ;;  %v1030_v4 = vmul.f32 -1.442695, %v331_v62 }
 0x673   :  { %1190 = vpow2.f32 %v1030_v4 }
 0x67b   :  { %v1189_v3 = vpop.eup %1188 }
 0x67c   :  { %346 = vrot.lane.b32.xlu0 %v1189_v3, %s1238_s15 }
 0x67d   :  { %v1191_v5 = vpop.eup %1190 }
 0x67e   :  { %v335_v6 = vadd.f32 1.0, %v1191_v5 }
 0x680   :  { %1192 = vrcp.f32 %v335_v6 }
 0x68a   :  { %v1193_v7 = vpop.eup %1192 }
 0x68b   :  { %v344_v11 = vmul.f32 %v1193_v7, %v342_v10 }
 0x6ee   :  { %v347_v8 = vpop.permute.xlu0 %346 }
 0x6ef   :  { %v349_v9 = vmul.f32 %v1193_v7, %v347_v8  ;;  %v1166_v8 = vld [vmem:[%s1507_s1] sm:$0xff]  }
 0x6f1   :  { %351 = vrot.lane.b32.xlu0 %v349_v9, %s1239_s16  ;;  %v1167_v9 = vld [vmem:[%s1507_s1 + $0x8] sm:$0xff]  }
 0x763   :  { %v352_v12 = vpop.permute.xlu0 %351 }
 0x764   :  { %v354_v13 = vadd.f32 %v352_v12, %v344_v11 }
 0x766   :  { %1194 = vtanh.f32 %v354_v13 }
 0x770   :  { %v1195_v14 = vpop.eup %1194 }
 0x771   :  { %357 = vrot.lane.b32.xlu1 %v1195_v14, %s1238_s15 }
 0x775   :  { %362 = vrot.lane.b32.xlu1 %v354_v13, %s1240_s17 }
 0x7e3   :  { %v358_v17 = vpop.permute.xlu1 %357 }
 0x7e4   :  { %v1344_v18 = vmul.f32 %v1193_v7, %v358_v17  ;;  %v1044_v17 = vld [vmem:[%s1508_s0 + $0xa] sm:$0x3] }
 0x7e6   :  { %367 = vrot.lane.b32.xlu0 %v1344_v18, %s1239_s16 }
 0x7e7   :  { %v363_v19 = vpop.permute.xlu1 %362 }
 0x7e8   :  { %365 = vst.msk [vmem:[#allocation3] sm:$0x3] %vm16_vm0, %v363_v19 }
 0x7ef   :  { %v463_v20 = vld [vmem:[#allocation3] sm:$0x3] }
 0x7f0   :  { %465 = vrot.lane.b32.xlu1 %v463_v20, %s1239_s16 }
 0x858   :  { %v368_v21 = vpop.permute.xlu0 %367 }
 0x859   :  { %370 = vst.msk [vmem:[#allocation2] sm:$0x3] %vm16_vm0, %v368_v21 }
 0x860   :  { %v394_v22 = vld [vmem:[#allocation2] sm:$0x3] }
 0x861   :  { %v395_v23 = vpack.c.bf16 %v394_v22, %v394_v22 }
 0x862   :  { %v466_v38 = vpop.permute.xlu1 %465 }
 0x863   :  { %1115 = vmatmul.mubr.msk.bf16.vlgmr.msra.gmra.mrb[4].mxu1 %vm38_vm2, %v395_v23 }
 0x864   :  { %1130 = vmatprep.mubr.msk.bf16.mxu1 %vm1237_vm1, %v1236_v0  ;;  %1127 = vmatpush3.bf16.msra.mxu1 %v1166_v8 }
 0x865   :  { %1128 = vmatprep.subr.bf16.mxu1 %v1236_v0 }
 0x868   :  { %1129 = vmatpush3.bf16.msra.mxu1 %v1167_v9 }
 0x869   :  { %1142 = vmatprep.subr.bf16.mxu1 %v1236_v0 }
 0x936   :  { %v449_v25 = vpop.f32.mrb[4].mxu1 }
 0x937   :  { %v455_v26 = vadd.f32 %v1032_v24, %v449_v25  ;;  %v1116_v28 = vpop.f32.mrb[5].mxu1 }
 0x938   :  { %v452_v29 = vpop.f32.mrb[6].mxu1 }
 0x939   :  { %1196 = vtanh.f32 %v455_v26  ;;  %v1117_v30 = vpop.f32.mrb[7].mxu1  ;;  %v1036_v32 = vmul.f32 -1.442695, %v455_v26 }
 0x93b   :  { %1198 = vpow2.f32 %v1036_v32 }
 0x943   :  { %v1197_v31 = vpop.eup %1196 }
 0x944   :  { %470 = vrot.lane.b32.xlu0 %v1197_v31, %s1238_s15 }
 0x945   :  { %v1199_v33 = vpop.eup %1198 }
 0x946   :  { %v459_v34 = vadd.f32 1.0, %v1199_v33 }
 0x948   :  { %1200 = vrcp.f32 %v459_v34 }
 0x952   :  { %v1201_v35 = vpop.eup %1200 }
 0x953   :  { %v468_v39 = vmul.f32 %v1201_v35, %v466_v38  ;;  %v1169_v38 = vld [vmem:[%s1507_s1 + $0x8] sm:$0xff]  }
 0x9b6   :  { %v471_v36 = vpop.permute.xlu0 %470 }
 0x9b7   :  { %v473_v37 = vmul.f32 %v1201_v35, %v471_v36 }
 0x9b9   :  { %475 = vrot.lane.b32.xlu0 %v473_v37, %s1239_s16  ;;  %v1168_v37 = vld [vmem:[%s1507_s1] sm:$0xff]  }
 0xa2b   :  { %v476_v40 = vpop.permute.xlu0 %475 }
 0xa2c   :  { %v478_v41 = vadd.f32 %v476_v40, %v468_v39 }
 0xa2e   :  { %1202 = vtanh.f32 %v478_v41 }
 0xa38   :  { %v1203_v42 = vpop.eup %1202 }
 0xa39   :  { %481 = vrot.lane.b32.xlu1 %v1203_v42, %s1238_s15 }
 0xa3d   :  { %486 = vrot.lane.b32.xlu1 %v478_v41, %s1240_s17 }
 0xaab   :  { %v482_v45 = vpop.permute.xlu1 %481 }
 0xaac   :  { %v1369_v46 = vmul.f32 %v1201_v35, %v482_v45 }
 0xaae   :  { %491 = vrot.lane.b32.xlu0 %v1369_v46, %s1239_s16 }
 0xaaf   :  { %v487_v47 = vpop.permute.xlu1 %486 }
 0xab0   :  { %489 = vst.msk [vmem:[#allocation3] sm:$0x3] %vm16_vm0, %v487_v47  ;;  %v1050_v47 = vld [vmem:[%s1508_s0 + $0xc] sm:$0x3] }
 0xab7   :  { %v587_v48 = vld [vmem:[#allocation3] sm:$0x3] }
 0xab8   :  { %589 = vrot.lane.b32.xlu1 %v587_v48, %s1239_s16 }
 0xb20   :  { %v492_v49 = vpop.permute.xlu0 %491 }
 0xb21   :  { %494 = vst.msk [vmem:[#allocation2] sm:$0x3] %vm16_vm0, %v492_v49 }
 0xb28   :  { %v518_v50 = vld [vmem:[#allocation2] sm:$0x3] }
 0xb29   :  { %v519_v51 = vpack.c.bf16 %v518_v50, %v518_v50 }
 0xb2a   :  { %v590_v3 = vpop.permute.xlu1 %589 }
 0xb2b   :  { %1123 = vmatmul.mubr.msk.bf16.vlgmr.msra.gmra.mrb[8].mxu0 %vm38_vm2, %v519_v51 }
 0xb2c   :  { %1138 = vmatprep.mubr.msk.bf16.mxu0 %vm1237_vm1, %v1236_v0  ;;  %1135 = vmatpush3.bf16.msra.mxu0 %v1168_v37 }
 0xb2d   :  { %1136 = vmatprep.subr.bf16.mxu0 %v1236_v0 }
 0xb30   :  { %1137 = vmatpush3.bf16.msra.mxu0 %v1169_v38 }
 0xbfe   :  { %v573_v53 = vpop.f32.mrb[8].mxu0 }
 0xbff   :  { %v579_v55 = vadd.f32 %v1038_v52, %v573_v53  ;;  %v1124_v56 = vpop.f32.mrb[9].mxu0 }
 0xc00   :  { %v576_v57 = vpop.f32.mrb[10].mxu0 }
 0xc01   :  { %1204 = vtanh.f32 %v579_v55  ;;  %v1125_v58 = vpop.f32.mrb[11].mxu0  ;;  %v1042_v60 = vmul.f32 -1.442695, %v579_v55 }
 0xc03   :  { %1206 = vpow2.f32 %v1042_v60 }
 0xc0b   :  { %v1205_v59 = vpop.eup %1204 }
 0xc0c   :  { %594 = vrot.lane.b32.xlu0 %v1205_v59, %s1238_s15 }
 0xc0d   :  { %v1207_v61 = vpop.eup %1206 }
 0xc0e   :  { %v583_v62 = vadd.f32 1.0, %v1207_v61 }
 0xc10   :  { %1208 = vrcp.f32 %v583_v62 }
 0xc1a   :  { %v1209_v63 = vpop.eup %1208 }
 0xc1b   :  { %v592_v4 = vmul.f32 %v1209_v63, %v590_v3  ;;  %v1170_v3 = vld [vmem:[%s1507_s1] sm:$0xff]  }
 0xc7e   :  { %v595_v1 = vpop.permute.xlu0 %594 }
 0xc7f   :  { %v597_v2 = vmul.f32 %v1209_v63, %v595_v1 }
 0xc81   :  { %599 = vrot.lane.b32.xlu0 %v597_v2, %s1239_s16 }
 0xcf3   :  { %v600_v5 = vpop.permute.xlu0 %599 }
 0xcf4   :  { %v602_v6 = vadd.f32 %v600_v5, %v592_v4  ;;  %v1171_v4 = vld [vmem:[%s1507_s1 + $0x8] sm:$0xff]  }
 0xcf6   :  { %1210 = vtanh.f32 %v602_v6 }
 0xd00   :  { %v1211_v7 = vpop.eup %1210 }
 0xd01   :  { %605 = vrot.lane.b32.xlu1 %v1211_v7, %s1238_s15 }
 0xd05   :  { %610 = vrot.lane.b32.xlu1 %v602_v6, %s1240_s17 }
 0xd73   :  { %v606_v10 = vpop.permute.xlu1 %605 }
 0xd74   :  { %v1394_v11 = vmul.f32 %v1209_v63, %v606_v10 }
 0xd76   :  { %615 = vrot.lane.b32.xlu0 %v1394_v11, %s1239_s16  ;;  %v619_v37 = vpack.c.bf16 %v1394_v11, %v1394_v11 }
 0xd77   :  { %v611_v12 = vpop.permute.xlu1 %610 }
 0xd78   :  { %613 = vst.msk [vmem:[#allocation3] sm:$0x3] %vm16_vm0, %v611_v12 }
 0xd7f   :  { %v711_v13 = vld [vmem:[#allocation3] sm:$0x3] }
 0xd80   :  { %713 = vrot.lane.b32.xlu1 %v711_v13, %s1239_s16 }
 0xde8   :  { %v616_v14 = vpop.permute.xlu0 %615 }
 0xde9   :  { %618 = vst.msk [vmem:[#allocation2] sm:$0x3] %vm16_vm0, %v616_v14 }
 0xdf0   :  { %v642_v15 = vld [vmem:[#allocation2] sm:$0x3] }
 0xdf1   :  { %v643_v16 = vpack.c.bf16 %v642_v15, %v642_v15 }
 0xdf2   :  { %v714_v32 = vpop.permute.xlu1 %713 }
 0xdf3   :  { %1131 = vmatmul.mubr.msk.bf16.vlgmr.msra.gmra.mrb[8].mxu1 %vm38_vm2, %v643_v16 }
 0xdf4   :  { %1146 = vmatprep.mubr.msk.bf16.mxu1 %vm1237_vm1, %v1236_v0  ;;  %1143 = vmatpush3.bf16.msra.mxu1 %v1170_v3 }
 0xdf5   :  { %1144 = vmatprep.subr.bf16.mxu1 %v1236_v0  ;;  %v1056_v0 = vld [vmem:[%s1508_s0 + $0xe] sm:$0x3] }
 0xdf8   :  { %1145 = vmatpush3.bf16.msra.mxu1 %v1171_v4 }
 0xec6   :  { %v697_v19 = vpop.f32.mrb[8].mxu1 }
 0xec7   :  { %v703_v20 = vadd.f32 %v1044_v17, %v697_v19  ;;  %v1132_v21 = vpop.f32.mrb[9].mxu1 }
 0xec8   :  { %v700_v22 = vpop.f32.mrb[10].mxu1 }
 0xec9   :  { %1212 = vtanh.f32 %v703_v20  ;;  %v1133_v23 = vpop.f32.mrb[11].mxu1  ;;  %v1048_v25 = vmul.f32 -1.442695, %v703_v20 }
 0xeca   :  { %v1241_v23 = vmov 1966171168  }
 0xecb   :  { %1214 = vpow2.f32 %v1048_v25  ;;  %v128_v25 = vlaneseq }
 0xed3   :  { %v1213_v24 = vpop.eup %1212 }
 0xed4   :  { %718 = vrot.lane.b32.xlu0 %v1213_v24, %s1238_s15  ;;  %v126_v24 = vunpack.c.l.s4 %v1241_v23 }
 0xed5   :  { %v1215_v26 = vpop.eup %1214 }
 0xed6   :  { %v707_v28 = vadd.f32 1.0, %v1215_v26  ;;  %v127_v26 = vunpack.c.0.s8 %v126_v24 }
 0xed8   :  { %1216 = vrcp.f32 %v707_v28  ;;  %v129_v28 = vshrl.u32 %v128_v25, 7 }
 0xee2   :  { %v1217_v29 = vpop.eup %1216 }
 0xee3   :  { %v716_v33 = vmul.f32 %v1217_v29, %v714_v32 }
 0xf46   :  { %v719_v30 = vpop.permute.xlu0 %718 }
 0xf47   :  { %v721_v31 = vmul.f32 %v1217_v29, %v719_v30  ;;  %v123_v30 = vpack.c.bf16 %v1294_v27, %v1294_v27 }
 0xf49   :  { %723 = vrot.lane.b32.xlu0 %v721_v31, %s1239_s16 }
 0xfbb   :  { %v724_v34 = vpop.permute.xlu0 %723 }
 0xfbc   :  { %v726_v35 = vadd.f32 %v724_v34, %v716_v33  ;;  %v371_v34 = vpack.c.bf16 %v1344_v18, %v1344_v18 }
 0xfbe   :  { %1218 = vtanh.f32 %v726_v35 }
 0xfc8   :  { %v1219_v36 = vpop.eup %1218 }
 0xfc9   :  { %729 = vrot.lane.b32.xlu1 %v1219_v36, %s1238_s15 }
 0xfcd   :  { %734 = vrot.lane.b32.xlu1 %v726_v35, %s1240_s17 }
0x103b   :  { %v730_v39 = vpop.permute.xlu1 %729 }
0x103c   :  { %v1418_v40 = vmul.f32 %v1217_v29, %v730_v39  ;;  %v130_v29 = vsub.s32 %v127_v26, %v129_v28 }
0x103e   :  { %739 = vrot.lane.b32.xlu0 %v1418_v40, %s1239_s16  ;;  %v131_v33 = vrot.slane %v123_v30, %v130_v29  ;;  %v379_v36 = vrot.slane %v371_v34, %v130_v29  ;;  %v627_v39 = vrot.slane %v619_v37, %v130_v29 }
0x103f   :  { %v735_v41 = vpop.permute.xlu1 %734 }
0x1040   :  { %737 = vst.msk [vmem:[#allocation3] sm:$0x3] %vm16_vm0, %v735_v41  ;;  %v138_v38 = vrot.slane %v131_v33, %v130_v29 }
0x1047   :  { %v835_v42 = vld [vmem:[#allocation3] sm:$0x3] }
0x1048   :  { %837 = vrot.lane.b32.xlu1 %v835_v42, %s1239_s16  ;;  %v386_v42 = vrot.slane %v379_v36, %v130_v29 }
0x10b0   :  { %v740_v43 = vpop.permute.xlu0 %739 }
0x10b1   :  { %742 = vst.msk [vmem:[#allocation2] sm:$0x3] %vm16_vm0, %v740_v43  ;;  %v634_v43 = vrot.slane %v627_v39, %v130_v29 }
0x10b8   :  { %v766_v44 = vld [vmem:[#allocation2] sm:$0x3] }
0x10b9   :  { %v767_v45 = vpack.c.bf16 %v766_v44, %v766_v44 }
0x10ba   :  { %v838_v61 = vpop.permute.xlu1 %837 }
0x10bb   :  { %1139 = vmatmul.mubr.msk.bf16.vlgmr.msra.gmra.mrb[12].mxu0 %vm38_vm2, %v767_v45 }
0x118e   :  { %v821_v48 = vpop.f32.mrb[12].mxu0 }
0x118f   :  { %v827_v49 = vadd.f32 %v1050_v47, %v821_v48  ;;  %v1140_v50 = vpop.f32.mrb[13].mxu0 }
0x1190   :  { %v824_v51 = vpop.f32.mrb[14].mxu0 }
0x1191   :  { %1220 = vtanh.f32 %v827_v49  ;;  %v1141_v52 = vpop.f32.mrb[15].mxu0  ;;  %v1054_v55 = vmul.f32 -1.442695, %v827_v49  ;;  %v247_v49 = vpack.c.bf16 %v1319_v54, %v1319_v54 }
0x1192   :  { %v495_v52 = vpack.c.bf16 %v1369_v46, %v1369_v46 }
0x1193   :  { %1222 = vpow2.f32 %v1054_v55  ;;  %v255_v51 = vrot.slane %v247_v49, %v130_v29 }
0x1194   :  { %v503_v54 = vrot.slane %v495_v52, %v130_v29 }
0x119b   :  { %v1221_v53 = vpop.eup %1220 }
0x119c   :  { %842 = vrot.lane.b32.xlu0 %v1221_v53, %s1238_s15 }
0x119d   :  { %v1223_v56 = vpop.eup %1222 }
0x119e   :  { %v831_v57 = vadd.f32 1.0, %v1223_v56  ;;  %v743_v56 = vpack.c.bf16 %v1418_v40, %v1418_v40 }
0x11a0   :  { %1224 = vrcp.f32 %v831_v57  ;;  %v751_v46 = vrot.slane %v743_v56, %v130_v29 }
0x11aa   :  { %v1225_v58 = vpop.eup %1224 }
0x11ab   :  { %v840_v62 = vmul.f32 %v1225_v58, %v838_v61 }
0x120e   :  { %v843_v59 = vpop.permute.xlu0 %842 }
0x120f   :  { %v845_v60 = vmul.f32 %v1225_v58, %v843_v59  ;;  %v510_v59 = vrot.slane %v503_v54, %v130_v29 }
0x1211   :  { %847 = vrot.lane.b32.xlu0 %v845_v60, %s1239_s16  ;;  %v758_v60 = vrot.slane %v751_v46, %v130_v29 }
0x1283   :  { %v848_v63 = vpop.permute.xlu0 %847 }
0x1284   :  { %v850_v1 = vadd.f32 %v848_v63, %v840_v62 }
0x1286   :  { %1226 = vtanh.f32 %v850_v1 }
0x1290   :  { %v1227_v2 = vpop.eup %1226 }
0x1291   :  { %853 = vrot.lane.b32.xlu1 %v1227_v2, %s1238_s15 }
0x1295   :  { %858 = vrot.lane.b32.xlu1 %v850_v1, %s1240_s17 }
0x1303   :  { %v854_v5 = vpop.permute.xlu1 %853 }
0x1304   :  { %v856_v6 = vmul.f32 %v1225_v58, %v854_v5  ;;  %v262_v58 = vrot.slane %v255_v51, %v130_v29 }
0x1306   :  { %863 = vrot.lane.b32.xlu0 %v856_v6, %s1239_s16  ;;  %v867_v41 = vpack.c.bf16 %v856_v6, %v856_v6 }
0x1307   :  { %v859_v7 = vpop.permute.xlu1 %858 }
0x1308   :  { %861 = vst.msk [vmem:[#allocation3] sm:$0x3] %vm16_vm0, %v859_v7  ;;  %v875_v27 = vrot.slane %v867_v41, %v130_v29 }
0x130a   :  { %v882_v18 = vrot.slane %v875_v27, %v130_v29 }
0x130f   :  { %v959_v8 = vld [vmem:[#allocation3] sm:$0x3] }
0x1310   :  { %961 = vrot.lane.b32.xlu1 %v959_v8, %s1239_s16 }
0x1378   :  { %v864_v9 = vpop.permute.xlu0 %863 }
0x1379   :  { %866 = vst.msk [vmem:[#allocation2] sm:$0x3] %vm16_vm0, %v864_v9 }
0x1380   :  { %v890_v10 = vld [vmem:[#allocation2] sm:$0x3] }
0x1381   :  { %v891_v12 = vpack.c.bf16 %v890_v10, %v890_v10 }
0x1382   :  { %v962_v44 = vpop.permute.xlu1 %961 }
0x1383   :  { %1147 = vmatmul.mubr.msk.bf16.vlgmr.msra.gmra.mrb[12].mxu1 %vm38_vm2, %v891_v12 }
0x1456   :  { %v945_v13 = vpop.f32.mrb[12].mxu1 }
0x1457   :  { %v951_v14 = vadd.f32 %v1056_v0, %v945_v13  ;;  %v1148_v15 = vpop.f32.mrb[13].mxu1 }
0x1458   :  { %v948_v16 = vpop.f32.mrb[14].mxu1 }
0x1459   :  { %1228 = vtanh.f32 %v951_v14  ;;  %v1149_v17 = vpop.f32.mrb[15].mxu1  ;;  %v1060_v20 = vmul.f32 -1.442695, %v951_v14 }
0x145b   :  { %1230 = vpow2.f32 %v1060_v20 }
0x1463   :  { %v1229_v19 = vpop.eup %1228 }
0x1464   :  { %966 = vrot.lane.b32.xlu0 %v1229_v19, %s1238_s15 }
0x1465   :  { %v1231_v21 = vpop.eup %1230 }
0x1466   :  { %v955_v22 = vadd.f32 1.0, %v1231_v21 }
0x1468   :  { %1232 = vrcp.f32 %v955_v22 }
0x1472   :  { %v1233_v31 = vpop.eup %1232 }
0x1473   :  { %v964_v45 = vmul.f32 %v1233_v31, %v962_v44 }
0x14d6   :  { %v967_v32 = vpop.permute.xlu0 %966 }
0x14d7   :  { %v969_v35 = vmul.f32 %v1233_v31, %v967_v32 }
0x14d9   :  { %971 = vrot.lane.b32.xlu0 %v969_v35, %s1239_s16 }
0x14dd   :  { %139 = vrot.lane.b32.xlu0 %v138_v38, %s1239_s16 }
0x14e1   :  { %387 = vrot.lane.b32.xlu0 %v386_v42, %s1239_s16 }
0x14e5   :  { %635 = vrot.lane.b32.xlu0 %v634_v43, %s1239_s16 }
0x14e9   :  { %883 = vrot.lane.b32.xlu0 %v882_v18, %s1239_s16 }
0x154b   :  { %v972_v47 = vpop.permute.xlu0 %971 }
0x154c   :  { %v974_v48 = vadd.f32 %v972_v47, %v964_v45 }
0x154e   :  { %1234 = vtanh.f32 %v974_v48 }
0x154f   :  { %v140_v11 = vpop.permute.xlu0 %139 }
0x1550   :  { %143 = vst.msk [vmem:[%s1509_s2] sm:$0x1] %vm142_vm3, %v140_v11 }
0x1553   :  { %v388_v50 = vpop.permute.xlu0 %387 }
0x1554   :  { %1031 = vst.msk [vmem:[%s1509_s2 + $0x2] sm:$0x1] %vm142_vm3, %v388_v50 }
0x1557   :  { %v636_v53 = vpop.permute.xlu0 %635 }
0x1558   :  { %v1235_v55 = vpop.eup %1234  ;;  %1043 = vst.msk [vmem:[%s1509_s2 + $0x4] sm:$0x1] %vm142_vm3, %v636_v53 }
0x1559   :  { %977 = vrot.lane.b32.xlu1 %v1235_v55, %s1238_s15 }
0x155b   :  { %v884_v57 = vpop.permute.xlu0 %883 }
0x155c   :  { %1055 = vst.msk [vmem:[%s1509_s2 + $0x6] sm:$0x1] %vm142_vm3, %v884_v57 }
0x155d   :  { %263 = vrot.lane.b32.xlu1 %v262_v58, %s1239_s16 }
0x1561   :  { %511 = vrot.lane.b32.xlu1 %v510_v59, %s1239_s16 }
0x1565   :  { %759 = vrot.lane.b32.xlu1 %v758_v60, %s1239_s16 }
0x1569   :  { %982 = vrot.lane.b32.xlu1 %v974_v48, %s1240_s17 }
0x15cb   :  { %v978_v61 = vpop.permute.xlu1 %977 }
0x15cc   :  { %v980_v40 = vmul.f32 %v1233_v31, %v978_v61 }
0x15ce   :  { %v991_v62 = vpack.c.bf16 %v980_v40, %v980_v40  ;;  %987 = vrot.lane.b32.xlu0 %v980_v40, %s1239_s16 }
0x15cf   :  { %v264_v63 = vpop.permute.xlu1 %263 }
0x15d0   :  { %v999_v1 = vrot.slane %v991_v62, %v130_v29  ;;  %1025 = vst.msk [vmem:[%s1509_s2 + $0x1] sm:$0x1] %vm142_vm3, %v264_v63 }
0x15d2   :  { %v1006_v2 = vrot.slane %v999_v1, %v130_v29 }
0x15d3   :  { %v512_v3 = vpop.permute.xlu1 %511 }
0x15d4   :  { %1037 = vst.msk [vmem:[%s1509_s2 + $0x3] sm:$0x1] %vm142_vm3, %v512_v3  ;;  %1007 = vrot.lane.b32.xlu1 %v1006_v2, %s1239_s16 }
0x15d7   :  { %v760_v4 = vpop.permute.xlu1 %759 }
0x15d8   :  { %1049 = vst.msk [vmem:[%s1509_s2 + $0x5] sm:$0x1] %vm142_vm3, %v760_v4 }
0x15db   :  { %v983_v5 = vpop.permute.xlu1 %982 }
0x15dc   :  { %985 = vst.msk [vmem:[#allocation3] sm:$0x3] %vm16_vm0, %v983_v5 }
0x1640   :  { %v988_v6 = vpop.permute.xlu0 %987 }
0x1641   :  { %990 = vst.msk [vmem:[#allocation2] sm:$0x3] %vm16_vm0, %v988_v6 }
0x1646   :  { %v1008_v7 = vpop.permute.xlu1 %1007 }
0x1647   :  { %1061 = vst.msk [vmem:[%s1509_s2 + $0x7] sm:$0x1] %vm142_vm3, %v1008_v7 }

</bundles_post_ra>
